<compile_context>
chip_gen: v6e
topology: v6e:2x2x1
jax: 0.10.0
libtpu: 0.0.40
codegen_flags: <defaults>
</compile_context>

<pallas_src>
import math
import functools

import jax
import jax.numpy as jnp
from jax.experimental import pallas as pl
from jax.experimental.pallas import tpu as pltpu


# --------------------------------------------------------------------------- #
# Kernel: one BertCrossAttentionLayer for one (batch, query-tile) grid step.
# --------------------------------------------------------------------------- #
def bert_cross_layer_kernel(
    s1_ref, s2_ref, mask_ref,
    wq_ref, bq_ref, wk_ref, bk_ref, wv_ref, bv_ref,
    wo_ref, bo_ref, g1_ref, be1_ref,
    wi_ref, bi_ref, wo2_ref, bo2_ref, g2_ref, be2_ref,
    out_ref,
    k_sc, v_sc, ctx_sc,
    *, num_heads, head_dim, ln_eps, ffn_chunk):
    f32 = jnp.float32
    bf16 = jnp.bfloat16

    # ---- K/V: compute once per batch element, cache in persistent VMEM ------
    @pl.when(pl.program_id(1) == 0)
    def _():
        s2_b = s2_ref[0]                                    # (S2, H) bf16
        k = jnp.dot(s2_b, wk_ref[...], preferred_element_type=f32) + bk_ref[...]
        v = jnp.dot(s2_b, wv_ref[...], preferred_element_type=f32) + bv_ref[...]
        k_sc[...] = k.astype(bf16)
        v_sc[...] = v.astype(bf16)

    s1_b = s1_ref[0]                                        # (TQ, H) bf16
    s1_f = s1_b.astype(f32)                                 # residual in f32

    # ---- Q projection (scale folded in once) ---------------------------------
    scale = 1.0 / math.sqrt(head_dim)
    q = (jnp.dot(s1_b, wq_ref[...], preferred_element_type=f32)
         + bq_ref[...]) * scale
    q_b = q.astype(bf16)
    k_b = k_sc[...]                                         # (S2, H) bf16
    v_b = v_sc[...]                                         # (S2, H) bf16

    tq = s1_b.shape[0]
    hsz = s1_b.shape[1]
    s2_len = k_b.shape[0]

    # Hoisted additive-mask broadcast (JAX does not CSE broadcast_in_dim).
    mask_f = jnp.broadcast_to(mask_ref[0], (tq, s2_len)).astype(f32)

    # Contract the last dims of (TQ, hd) x (S2, hd) -> (TQ, S2); no explicit .T.
    dn = (((1,), (1,)), ((), ()))

    # Per-head attention; contexts written into a (TQ, H) scratch so the output
    # projection is one dense MXU matmul instead of num_heads K=head_dim ones.
    for h in range(num_heads):                              # static, unrolled
        sl = slice(h * head_dim, (h + 1) * head_dim)
        scores = jax.lax.dot_general(
            q_b[:, sl], k_b[:, sl], dn, preferred_element_type=f32) + mask_f
        m = jnp.max(scores, axis=-1, keepdims=True)
        e = jnp.exp(scores - m)
        denom = jnp.sum(e, axis=-1, keepdims=True)
        probs = e * pl.reciprocal(denom, approx=True)
        ctx_h = jnp.dot(probs.astype(bf16), v_b[:, sl],
                        preferred_element_type=f32)         # (TQ, hd)
        ctx_sc[:, sl] = ctx_h.astype(bf16)

    # Dense attention-output projection: (TQ, H) @ (H, H), full MXU K dim.
    att_acc = jnp.dot(ctx_sc[...], wo_ref[...], preferred_element_type=f32)

    def layer_norm(x, gamma, beta):
        u = jnp.mean(x, axis=-1, keepdims=True)
        var = jnp.mean((x - u) ** 2, axis=-1, keepdims=True)
        return gamma * ((x - u) * jax.lax.rsqrt(var + ln_eps)) + beta

    # ---- BertSelfOutput: (+bias) + residual(s1) + LayerNorm ------------------
    att = layer_norm(att_acc + bo_ref[...] + s1_f, g1_ref[...], be1_ref[...])
    att_b = att.astype(bf16)

    # ---- BertIntermediate + BertOutput, chunked over I to bound (TQ, I) ------
    wi = wi_ref[...]                                        # (H, I) bf16
    wo2 = wo2_ref[...]                                      # (I, H) bf16
    bi = bi_ref[...]                                        # (1, I) f32
    inter_size = wi.shape[1]
    n_chunks = inter_size // ffn_chunk

    inv_sqrt2 = 1.0 / math.sqrt(2.0)
    out_acc = jnp.zeros((tq, hsz), f32)
    for c in range(n_chunks):                               # static, unrolled
        cs = slice(c * ffn_chunk, (c + 1) * ffn_chunk)
        inter = jnp.dot(att_b, wi[:, cs], preferred_element_type=f32) + bi[:, cs]
        inter = inter * 0.5 * (1.0 + jax.lax.erf(inter * inv_sqrt2))  # erf-gelu
        out_acc = out_acc + jnp.dot(inter.astype(bf16), wo2[cs, :],
                                    preferred_element_type=f32)

    out = layer_norm(out_acc + bo2_ref[...] + att, g2_ref[...], be2_ref[...])
    out_ref[0] = out.astype(out_ref.dtype)


# --------------------------------------------------------------------------- #
# Wrappers
# --------------------------------------------------------------------------- #
def _pick_q_tile(s1_len):
    # Prefer 128 for pipelining / megacore balance; fall back to any divisor.
    for t in (128, 256, 64, 32, 16, 8):
        if s1_len % t == 0:
            return t
    return s1_len


def _pick_ffn_chunk(inter_size):
    for c in (512, 256, 128):
        if inter_size % c == 0:
            return c
    return inter_size


def _vmem_limit_bytes():
    # Derive from the actual chip, leave headroom for compiler scratch/spills.
    try:
        cap = getattr(pltpu.get_tpu_info(), "vmem_capacity_bytes", None)
    except Exception:
        cap = None
    if not cap:
        cap = 128 * 1024 * 1024
    return int(min((cap * 3) // 4, 100 * 1024 * 1024))


def bert_cross_attention_layer(s1, s2, mask, params, *, num_heads, ln_eps=1e-12):
    """One BertCrossAttentionLayer.

    s1: [B, S1, H] bf16 (query side), s2: [B, S2, H] bf16 (key/value side),
    mask: [B, 1, S2] f32 additive mask. Returns [B, S1, H] bf16.
    """
    B, S1, H = s1.shape
    _, S2, _ = s2.shape
    I = params["wi"].shape[1]
    assert H % num_heads == 0, "hidden size must be divisible by num_heads"
    head_dim = H // num_heads
    tq = _pick_q_tile(S1)
    n_q_tiles = S1 // tq
    ffn_chunk = _pick_ffn_chunk(I)

    bf16 = jnp.bfloat16
    f32 = jnp.float32
    # Matmul weights in bf16 (MXU); biases and LayerNorm params stay f32.
    wq = params["wq"].astype(bf16)
    wk = params["wk"].astype(bf16)
    wv = params["wv"].astype(bf16)
    wo = params["wo"].astype(bf16)
    wi = params["wi"].astype(bf16)
    wo2 = params["wo2"].astype(bf16)

    seq1_spec = pl.BlockSpec((1, tq, H), lambda b, qi: (b, qi, 0))
    seq2_spec = pl.BlockSpec((1, S2, H), lambda b, qi: (b, 0, 0))
    mask_spec = pl.BlockSpec((1, 1, S2), lambda b, qi: (b, 0, 0))
    # Grid-invariant weight blocks (constant index map -> fetched once per call).
    full2d = lambda shape: pl.BlockSpec(shape, lambda b, qi: (0, 0))

    in_specs = [
        seq1_spec,                       # s1 (query side, tiled over S1)
        seq2_spec,                       # s2 (key/value side, full per batch)
        mask_spec,                       # additive mask
        full2d((H, H)), full2d((1, H)),  # Wq, bq
        full2d((H, H)), full2d((1, H)),  # Wk, bk
        full2d((H, H)), full2d((1, H)),  # Wv, bv
        full2d((H, H)), full2d((1, H)),  # Wo (attn out), bo
        full2d((1, H)), full2d((1, H)),  # LN1 gamma, beta
        full2d((H, I)), full2d((1, I)),  # Wi (intermediate), bi
        full2d((I, H)), full2d((1, H)),  # Wo2 (ffn out), bo2
        full2d((1, H)), full2d((1, H)),  # LN2 gamma, beta
    ]

    kernel = functools.partial(
        bert_cross_layer_kernel,
        num_heads=num_heads, head_dim=head_dim, ln_eps=ln_eps,
        ffn_chunk=ffn_chunk)

    return pl.pallas_call(
        kernel,
        out_shape=jax.ShapeDtypeStruct((B, S1, H), bf16),
        grid=(B, n_q_tiles),
        in_specs=in_specs,
        out_specs=pl.BlockSpec((1, tq, H), lambda b, qi: (b, qi, 0)),
        scratch_shapes=[
            pltpu.VMEM((S2, H), bf16),   # cached K (per batch element)
            pltpu.VMEM((S2, H), bf16),   # cached V
            pltpu.VMEM((tq, H), bf16),   # per-head context assembly
        ],
        compiler_params=pltpu.CompilerParams(
            # q-tile axis must stay on one core (K/V cache lives in scratch).
            dimension_semantics=("parallel", "arbitrary"),
            vmem_limit_bytes=_vmem_limit_bytes()),
    )(s1.astype(bf16), s2.astype(bf16), mask.astype(f32),
      wq, params["bq"], wk, params["bk"], wv, params["bv"],
      wo, params["bo"], params["g1"], params["be1"],
      wi, params["bi"], wo2, params["bo2"], params["g2"], params["be2"])


def bert_cross_encoder(s1, s2, mask, layer_params, *, num_heads, ln_eps=1e-12,
                       output_all_encoded_layers=True):
    """BertCrossEncoder.forward: stack of cross-attention layers over s1."""
    bf16 = jnp.bfloat16
    s1 = s1.astype(bf16)          # inter-layer activations stream in bf16
    s2 = s2.astype(bf16)          # cast once; reused by every layer
    mask = mask.astype(jnp.float32)
    all_encoder_layers = []
    for p in layer_params:
        s1 = bert_cross_attention_layer(s1, s2, mask, p,
                                        num_heads=num_heads, ln_eps=ln_eps)
        if output_all_encoded_layers:
            all_encoder_layers.append(s1)
    if not output_all_encoded_layers:
        all_encoder_layers.append(s1)
    return all_encoder_layers


# --------------------------------------------------------------------------- #
# Pure-JAX (f32) reference mirroring the PyTorch forward (eval mode).
# --------------------------------------------------------------------------- #
def reference_layer(s1, s2, mask, p, num_heads, ln_eps=1e-12):
    B, S1, H = s1.shape
    S2 = s2.shape[1]
    hd = H // num_heads

    def split(x, S):
        return x.reshape(B, S, num_heads, hd).transpose(0, 2, 1, 3)

    q = split(s1 @ p["wq"] + p["bq"][0], S1)
    k = split(s2 @ p["wk"] + p["bk"][0], S2)
    v = split(s2 @ p["wv"] + p["bv"][0], S2)
    scores = jnp.einsum("bhqd,bhkd->bhqk", q, k) / math.sqrt(hd)
    scores = scores + mask[:, None, :, :]
    probs = jax.nn.softmax(scores, axis=-1)
    ctx = jnp.einsum("bhqk,bhkd->bhqd", probs, v).transpose(0, 2, 1, 3).reshape(B, S1, H)

    def ln(x, g, b):
        u = x.mean(-1, keepdims=True)
        s = ((x - u) ** 2).mean(-1, keepdims=True)
        return g[0] * ((x - u) / jnp.sqrt(s + ln_eps)) + b[0]

    att = ln(ctx @ p["wo"] + p["bo"][0] + s1, p["g1"], p["be1"])
    inter = att @ p["wi"] + p["bi"][0]
    inter = inter * 0.5 * (1.0 + jax.lax.erf(inter / math.sqrt(2.0)))
    return ln(inter @ p["wo2"] + p["bo2"][0] + att, p["g2"], p["be2"])


def reference_encoder(s1, s2, mask, layer_params, num_heads, ln_eps=1e-12):
    outs = []
    for p in layer_params:
        s1 = reference_layer(s1, s2, mask, p, num_heads, ln_eps)
        outs.append(s1)
    return outs


# --------------------------------------------------------------------------- #
# Test
# --------------------------------------------------------------------------- #
if __name__ == "__main__":
    B, S1, S2 = 2, 8, 8
    H, NH, I = 32, 4, 64
    NUM_LAYERS = 2

    key = jax.random.PRNGKey(0)
    ks = jax.random.split(key, 16 * NUM_LAYERS + 3)

    def w(k, shape, scale=0.02):
        return (scale * jax.random.normal(k, shape)).astype(jnp.float32)

    layer_params = []
    for l in range(NUM_LAYERS):
        kk = ks[16 * l:16 * (l + 1)]
        layer_params.append({
            "wq": w(kk[0], (H, H)),  "bq": w(kk[1], (1, H)),
            "wk": w(kk[2], (H, H)),  "bk": w(kk[3], (1, H)),
            "wv": w(kk[4], (H, H)),  "bv": w(kk[5], (1, H)),
            "wo": w(kk[6], (H, H)),  "bo": w(kk[7], (1, H)),
            "g1": 1.0 + w(kk[8], (1, H), 0.05), "be1": w(kk[9], (1, H), 0.05),
            "wi": w(kk[10], (H, I)), "bi": w(kk[11], (1, I)),
            "wo2": w(kk[12], (I, H)), "bo2": w(kk[13], (1, H)),
            "g2": 1.0 + w(kk[14], (1, H), 0.05), "be2": w(kk[15], (1, H), 0.05),
        })

    s1 = jax.random.normal(ks[-3], (B, S1, H), dtype=jnp.float32)
    s2 = jax.random.normal(ks[-2], (B, S2, H), dtype=jnp.float32)
    # BERT-style extended additive mask: 0 for kept positions, -10000 for masked.
    keep = (jax.random.uniform(ks[-1], (B, 1, S2)) > 0.25).astype(jnp.float32)
    mask = (1.0 - keep) * -10000.0

    outs = bert_cross_encoder(s1, s2, mask, layer_params, num_heads=NH,
                              output_all_encoded_layers=True)
    outs = jax.block_until_ready(outs)

    refs = reference_encoder(s1, s2, mask, layer_params, NH)
    assert len(outs) == NUM_LAYERS
    for o, r in zip(outs, refs):
        assert o.shape == (B, S1, H)
        diff = jnp.abs(o.astype(jnp.float32) - r)
        err_max = float(jnp.max(diff))
        err_mean = float(jnp.mean(diff))
        # bf16 MXU + bf16 inter-layer activations vs f32 reference.
        assert err_max < 1e-1, f"max err {err_max}"
        assert err_mean < 2e-2, f"mean err {err_mean}"

    print("KERNEL_OK")
</pallas_src>

<mosaic_0001>
module attributes {stable_mosaic.version = 11 : i64} {
  func.func @bert_cross_layer_kernel(%arg0: i32, %arg1: i32, %arg2: memref<1x8x32xbf16, #tpu.memory_space<vmem>>, %arg3: memref<1x8x32xbf16, #tpu.memory_space<vmem>>, %arg4: memref<1x1x8xf32, #tpu.memory_space<vmem>>, %arg5: memref<32x32xbf16, #tpu.memory_space<vmem>>, %arg6: memref<1x32xf32, #tpu.memory_space<vmem>>, %arg7: memref<32x32xbf16, #tpu.memory_space<vmem>>, %arg8: memref<1x32xf32, #tpu.memory_space<vmem>>, %arg9: memref<32x32xbf16, #tpu.memory_space<vmem>>, %arg10: memref<1x32xf32, #tpu.memory_space<vmem>>, %arg11: memref<32x32xbf16, #tpu.memory_space<vmem>>, %arg12: memref<1x32xf32, #tpu.memory_space<vmem>>, %arg13: memref<1x32xf32, #tpu.memory_space<vmem>>, %arg14: memref<1x32xf32, #tpu.memory_space<vmem>>, %arg15: memref<32x64xbf16, #tpu.memory_space<vmem>>, %arg16: memref<1x64xf32, #tpu.memory_space<vmem>>, %arg17: memref<64x32xbf16, #tpu.memory_space<vmem>>, %arg18: memref<1x32xf32, #tpu.memory_space<vmem>>, %arg19: memref<1x32xf32, #tpu.memory_space<vmem>>, %arg20: memref<1x32xf32, #tpu.memory_space<vmem>>, %arg21: memref<1x8x32xbf16, #tpu.memory_space<vmem>>, %arg22: memref<8x32xbf16, #tpu.memory_space<vmem>>, %arg23: memref<8x32xbf16, #tpu.memory_space<vmem>>, %arg24: memref<8x32xbf16, #tpu.memory_space<vmem>>) attributes {dimension_semantics = [#tpu.dimension_semantics<parallel>, #tpu.dimension_semantics<arbitrary>], iteration_bounds = array<i64: 2, 1>, scalar_prefetch = 0 : i64, scratch_operands = 3 : i64, tpu.core_type = #tpu.core_type<tc>, window_params = [{transform_indices = @transform_0, window_bounds = array<i64: 1, 8, 32>}, {transform_indices = @transform_1, window_bounds = array<i64: 1, 8, 32>}, {transform_indices = @transform_2, window_bounds = array<i64: 1, 1, 8>}, {pipeline_mode = #tpu.pipeline_mode<synchronous>, transform_indices = @transform_3, window_bounds = array<i64: 32, 32>}, {pipeline_mode = #tpu.pipeline_mode<synchronous>, transform_indices = @transform_4, window_bounds = array<i64: 1, 32>}, {pipeline_mode = #tpu.pipeline_mode<synchronous>, transform_indices = @transform_5, window_bounds = array<i64: 32, 32>}, {pipeline_mode = #tpu.pipeline_mode<synchronous>, transform_indices = @transform_6, window_bounds = array<i64: 1, 32>}, {pipeline_mode = #tpu.pipeline_mode<synchronous>, transform_indices = @transform_7, window_bounds = array<i64: 32, 32>}, {pipeline_mode = #tpu.pipeline_mode<synchronous>, transform_indices = @transform_8, window_bounds = array<i64: 1, 32>}, {pipeline_mode = #tpu.pipeline_mode<synchronous>, transform_indices = @transform_9, window_bounds = array<i64: 32, 32>}, {pipeline_mode = #tpu.pipeline_mode<synchronous>, transform_indices = @transform_10, window_bounds = array<i64: 1, 32>}, {pipeline_mode = #tpu.pipeline_mode<synchronous>, transform_indices = @transform_11, window_bounds = array<i64: 1, 32>}, {pipeline_mode = #tpu.pipeline_mode<synchronous>, transform_indices = @transform_12, window_bounds = array<i64: 1, 32>}, {pipeline_mode = #tpu.pipeline_mode<synchronous>, transform_indices = @transform_13, window_bounds = array<i64: 32, 64>}, {pipeline_mode = #tpu.pipeline_mode<synchronous>, transform_indices = @transform_14, window_bounds = array<i64: 1, 64>}, {pipeline_mode = #tpu.pipeline_mode<synchronous>, transform_indices = @transform_15, window_bounds = array<i64: 64, 32>}, {pipeline_mode = #tpu.pipeline_mode<synchronous>, transform_indices = @transform_16, window_bounds = array<i64: 1, 32>}, {pipeline_mode = #tpu.pipeline_mode<synchronous>, transform_indices = @transform_17, window_bounds = array<i64: 1, 32>}, {pipeline_mode = #tpu.pipeline_mode<synchronous>, transform_indices = @transform_18, window_bounds = array<i64: 1, 32>}, {transform_indices = @transform_19, window_bounds = array<i64: 1, 8, 32>}]} {
    %c0_i32 = arith.constant 0 : i32
    %0 = arith.cmpi eq, %arg1, %c0_i32 : i32
    %1 = arith.extui %0 : i1 to i32
    %c0_i32_0 = arith.constant 0 : i32
    %2 = arith.cmpi ne, %1, %c0_i32_0 : i32
    scf.if %2 {
      %c0_78 = arith.constant 0 : index
      %c0_79 = arith.constant 0 : index
      %c0_80 = arith.constant 0 : index
      %178 = vector.load %arg3[%c0_78, %c0_79, %c0_80] : memref<1x8x32xbf16, #tpu.memory_space<vmem>>, vector<1x8x32xbf16>
      %179 = vector.shape_cast %178 : vector<1x8x32xbf16> to vector<8x32xbf16>
      %c0_81 = arith.constant 0 : index
      %c0_82 = arith.constant 0 : index
      %180 = vector.load %arg7[%c0_81, %c0_82] : memref<32x32xbf16, #tpu.memory_space<vmem>>, vector<32x32xbf16>
      %cst_83 = arith.constant dense<0.000000e+00> : vector<8x32xf32>
      %181 = tpu.matmul %179, %180, %cst_83 {dimension_numbers = #tpu.dot_dimension_numbers<[1], [0], [0], [1], [0, 0, 1, 1], [], []>} : vector<8x32xbf16>, vector<32x32xbf16>, vector<8x32xf32> -> vector<8x32xf32>
      %c0_84 = arith.constant 0 : index
      %c0_85 = arith.constant 0 : index
      %182 = vector.load %arg8[%c0_84, %c0_85] : memref<1x32xf32, #tpu.memory_space<vmem>>, vector<1x32xf32>
      %183 = vector.broadcast %182 : vector<1x32xf32> to vector<8x32xf32>
      %184 = arith.addf %181, %183 : vector<8x32xf32>
      %c0_86 = arith.constant 0 : index
      %c0_87 = arith.constant 0 : index
      %185 = vector.load %arg9[%c0_86, %c0_87] : memref<32x32xbf16, #tpu.memory_space<vmem>>, vector<32x32xbf16>
      %cst_88 = arith.constant dense<0.000000e+00> : vector<8x32xf32>
      %186 = tpu.matmul %179, %185, %cst_88 {dimension_numbers = #tpu.dot_dimension_numbers<[1], [0], [0], [1], [0, 0, 1, 1], [], []>} : vector<8x32xbf16>, vector<32x32xbf16>, vector<8x32xf32> -> vector<8x32xf32>
      %c0_89 = arith.constant 0 : index
      %c0_90 = arith.constant 0 : index
      %187 = vector.load %arg10[%c0_89, %c0_90] : memref<1x32xf32, #tpu.memory_space<vmem>>, vector<1x32xf32>
      %188 = vector.broadcast %187 : vector<1x32xf32> to vector<8x32xf32>
      %189 = arith.addf %186, %188 : vector<8x32xf32>
      %190 = arith.truncf %184 : vector<8x32xf32> to vector<8x32xbf16>
      %c0_91 = arith.constant 0 : index
      %c0_92 = arith.constant 0 : index
      %191 = vector.load %arg22[%c0_91, %c0_92] : memref<8x32xbf16, #tpu.memory_space<vmem>>, vector<8x32xbf16>
      tpu.vector_store %arg22[%c0_91, %c0_92], %190 {strides = array<i32>} : memref<8x32xbf16, #tpu.memory_space<vmem>>, vector<8x32xbf16>,
      %192 = arith.truncf %189 : vector<8x32xf32> to vector<8x32xbf16>
      %c0_93 = arith.constant 0 : index
      %c0_94 = arith.constant 0 : index
      %193 = vector.load %arg23[%c0_93, %c0_94] : memref<8x32xbf16, #tpu.memory_space<vmem>>, vector<8x32xbf16>
      tpu.vector_store %arg23[%c0_93, %c0_94], %192 {strides = array<i32>} : memref<8x32xbf16, #tpu.memory_space<vmem>>, vector<8x32xbf16>,
    } else {
    }
    %c0 = arith.constant 0 : index
    %c0_1 = arith.constant 0 : index
    %c0_2 = arith.constant 0 : index
    %3 = vector.load %arg2[%c0, %c0_1, %c0_2] : memref<1x8x32xbf16, #tpu.memory_space<vmem>>, vector<1x8x32xbf16>
    %4 = vector.shape_cast %3 : vector<1x8x32xbf16> to vector<8x32xbf16>
    %5 = arith.extf %4 : vector<8x32xbf16> to vector<8x32xf32>
    %c0_3 = arith.constant 0 : index
    %c0_4 = arith.constant 0 : index
    %6 = vector.load %arg5[%c0_3, %c0_4] : memref<32x32xbf16, #tpu.memory_space<vmem>>, vector<32x32xbf16>
    %cst = arith.constant dense<0.000000e+00> : vector<8x32xf32>
    %7 = tpu.matmul %4, %6, %cst {dimension_numbers = #tpu.dot_dimension_numbers<[1], [0], [0], [1], [0, 0, 1, 1], [], []>} : vector<8x32xbf16>, vector<32x32xbf16>, vector<8x32xf32> -> vector<8x32xf32>
    %c0_5 = arith.constant 0 : index
    %c0_6 = arith.constant 0 : index
    %8 = vector.load %arg6[%c0_5, %c0_6] : memref<1x32xf32, #tpu.memory_space<vmem>>, vector<1x32xf32>
    %9 = vector.broadcast %8 : vector<1x32xf32> to vector<8x32xf32>
    %10 = arith.addf %7, %9 : vector<8x32xf32>
    %cst_7 = arith.constant 0.353553385 : f32
    %11 = vector.broadcast %cst_7 : f32 to vector<8x32xf32>
    %12 = arith.mulf %10, %11 : vector<8x32xf32>
    %13 = arith.truncf %12 : vector<8x32xf32> to vector<8x32xbf16>
    %c0_8 = arith.constant 0 : index
    %c0_9 = arith.constant 0 : index
    %14 = vector.load %arg22[%c0_8, %c0_9] : memref<8x32xbf16, #tpu.memory_space<vmem>>, vector<8x32xbf16>
    %c0_10 = arith.constant 0 : index
    %c0_11 = arith.constant 0 : index
    %15 = vector.load %arg23[%c0_10, %c0_11] : memref<8x32xbf16, #tpu.memory_space<vmem>>, vector<8x32xbf16>
    %c0_12 = arith.constant 0 : index
    %c0_13 = arith.constant 0 : index
    %c0_14 = arith.constant 0 : index
    %16 = vector.load %arg4[%c0_12, %c0_13, %c0_14] : memref<1x1x8xf32, #tpu.memory_space<vmem>>, vector<1x1x8xf32>
    %17 = vector.shape_cast %16 : vector<1x1x8xf32> to vector<1x8xf32>
    %18 = vector.shape_cast %17 : vector<1x8xf32> to vector<1x8xf32>
    %19 = vector.broadcast %18 : vector<1x8xf32> to vector<8x8xf32>
    %20 = vector.extract_strided_slice %13 {offsets = [0, 0], sizes = [8, 8], strides = [1, 1]} : vector<8x32xbf16> to vector<8x8xbf16>
    %21 = vector.extract_strided_slice %14 {offsets = [0, 0], sizes = [8, 8], strides = [1, 1]} : vector<8x32xbf16> to vector<8x8xbf16>
    %cst_15 = arith.constant dense<0.000000e+00> : vector<8x8xf32>
    %22 = tpu.matmul %20, %21, %cst_15 {dimension_numbers = #tpu.dot_dimension_numbers<[1], [1], [0], [0], [0, 0, 1, 0], [], []>} : vector<8x8xbf16>, vector<8x8xbf16>, vector<8x8xf32> -> vector<8x8xf32>
    %23 = arith.addf %22, %19 : vector<8x8xf32>
    %cst_16 = arith.constant dense<0xFF800000> : vector<8xf32>
    %24 = vector.multi_reduction <maximumf>, %23, %cst_16 [1] : vector<8x8xf32> to vector<8xf32>
    %25 = vector.shape_cast %24 : vector<8xf32> to vector<8x1xf32>
    %26 = vector.broadcast %25 : vector<8x1xf32> to vector<8x8xf32>
    %27 = arith.subf %23, %26 : vector<8x8xf32>
    %28 = math.exp %27 : vector<8x8xf32>
    %cst_17 = arith.constant dense<0.000000e+00> : vector<8xf32>
    %29 = vector.multi_reduction <add>, %28, %cst_17 [1] : vector<8x8xf32> to vector<8xf32>
    %30 = vector.shape_cast %29 : vector<8xf32> to vector<8x1xf32>
    %31 = tpu.reciprocal %30 {approx = true} : vector<8x1xf32> -> vector<8x1xf32>
    %32 = vector.broadcast %31 : vector<8x1xf32> to vector<8x8xf32>
    %33 = arith.mulf %28, %32 : vector<8x8xf32>
    %34 = arith.truncf %33 : vector<8x8xf32> to vector<8x8xbf16>
    %35 = vector.extract_strided_slice %15 {offsets = [0, 0], sizes = [8, 8], strides = [1, 1]} : vector<8x32xbf16> to vector<8x8xbf16>
    %cst_18 = arith.constant dense<0.000000e+00> : vector<8x8xf32>
    %36 = tpu.matmul %34, %35, %cst_18 {dimension_numbers = #tpu.dot_dimension_numbers<[1], [0], [0], [1], [0, 0, 1, 1], [], []>} : vector<8x8xbf16>, vector<8x8xbf16>, vector<8x8xf32> -> vector<8x8xf32>
    %37 = arith.truncf %36 : vector<8x8xf32> to vector<8x8xbf16>
    %c0_19 = arith.constant 0 : index
    %c0_20 = arith.constant 0 : index
    %38 = vector.load %arg24[%c0_19, %c0_20] : memref<8x32xbf16, #tpu.memory_space<vmem>>, vector<8x8xbf16>
    tpu.vector_store %arg24[%c0_19, %c0_20], %37 {strides = array<i32>} : memref<8x32xbf16, #tpu.memory_space<vmem>>, vector<8x8xbf16>,
    %39 = vector.extract_strided_slice %13 {offsets = [0, 8], sizes = [8, 8], strides = [1, 1]} : vector<8x32xbf16> to vector<8x8xbf16>
    %40 = vector.extract_strided_slice %14 {offsets = [0, 8], sizes = [8, 8], strides = [1, 1]} : vector<8x32xbf16> to vector<8x8xbf16>
    %cst_21 = arith.constant dense<0.000000e+00> : vector<8x8xf32>
    %41 = tpu.matmul %39, %40, %cst_21 {dimension_numbers = #tpu.dot_dimension_numbers<[1], [1], [0], [0], [0, 0, 1, 0], [], []>} : vector<8x8xbf16>, vector<8x8xbf16>, vector<8x8xf32> -> vector<8x8xf32>
    %42 = arith.addf %41, %19 : vector<8x8xf32>
    %cst_22 = arith.constant dense<0xFF800000> : vector<8xf32>
    %43 = vector.multi_reduction <maximumf>, %42, %cst_22 [1] : vector<8x8xf32> to vector<8xf32>
    %44 = vector.shape_cast %43 : vector<8xf32> to vector<8x1xf32>
    %45 = vector.broadcast %44 : vector<8x1xf32> to vector<8x8xf32>
    %46 = arith.subf %42, %45 : vector<8x8xf32>
    %47 = math.exp %46 : vector<8x8xf32>
    %cst_23 = arith.constant dense<0.000000e+00> : vector<8xf32>
    %48 = vector.multi_reduction <add>, %47, %cst_23 [1] : vector<8x8xf32> to vector<8xf32>
    %49 = vector.shape_cast %48 : vector<8xf32> to vector<8x1xf32>
    %50 = tpu.reciprocal %49 {approx = true} : vector<8x1xf32> -> vector<8x1xf32>
    %51 = vector.broadcast %50 : vector<8x1xf32> to vector<8x8xf32>
    %52 = arith.mulf %47, %51 : vector<8x8xf32>
    %53 = arith.truncf %52 : vector<8x8xf32> to vector<8x8xbf16>
    %54 = vector.extract_strided_slice %15 {offsets = [0, 8], sizes = [8, 8], strides = [1, 1]} : vector<8x32xbf16> to vector<8x8xbf16>
    %cst_24 = arith.constant dense<0.000000e+00> : vector<8x8xf32>
    %55 = tpu.matmul %53, %54, %cst_24 {dimension_numbers = #tpu.dot_dimension_numbers<[1], [0], [0], [1], [0, 0, 1, 1], [], []>} : vector<8x8xbf16>, vector<8x8xbf16>, vector<8x8xf32> -> vector<8x8xf32>
    %56 = arith.truncf %55 : vector<8x8xf32> to vector<8x8xbf16>
    %c0_25 = arith.constant 0 : index
    %c8 = arith.constant 8 : index
    %57 = vector.load %arg24[%c0_25, %c8] : memref<8x32xbf16, #tpu.memory_space<vmem>>, vector<8x8xbf16>
    tpu.vector_store %arg24[%c0_25, %c8], %56 {strides = array<i32>} : memref<8x32xbf16, #tpu.memory_space<vmem>>, vector<8x8xbf16>,
    %58 = vector.extract_strided_slice %13 {offsets = [0, 16], sizes = [8, 8], strides = [1, 1]} : vector<8x32xbf16> to vector<8x8xbf16>
    %59 = vector.extract_strided_slice %14 {offsets = [0, 16], sizes = [8, 8], strides = [1, 1]} : vector<8x32xbf16> to vector<8x8xbf16>
    %cst_26 = arith.constant dense<0.000000e+00> : vector<8x8xf32>
    %60 = tpu.matmul %58, %59, %cst_26 {dimension_numbers = #tpu.dot_dimension_numbers<[1], [1], [0], [0], [0, 0, 1, 0], [], []>} : vector<8x8xbf16>, vector<8x8xbf16>, vector<8x8xf32> -> vector<8x8xf32>
    %61 = arith.addf %60, %19 : vector<8x8xf32>
    %cst_27 = arith.constant dense<0xFF800000> : vector<8xf32>
    %62 = vector.multi_reduction <maximumf>, %61, %cst_27 [1] : vector<8x8xf32> to vector<8xf32>
    %63 = vector.shape_cast %62 : vector<8xf32> to vector<8x1xf32>
    %64 = vector.broadcast %63 : vector<8x1xf32> to vector<8x8xf32>
    %65 = arith.subf %61, %64 : vector<8x8xf32>
    %66 = math.exp %65 : vector<8x8xf32>
    %cst_28 = arith.constant dense<0.000000e+00> : vector<8xf32>
    %67 = vector.multi_reduction <add>, %66, %cst_28 [1] : vector<8x8xf32> to vector<8xf32>
    %68 = vector.shape_cast %67 : vector<8xf32> to vector<8x1xf32>
    %69 = tpu.reciprocal %68 {approx = true} : vector<8x1xf32> -> vector<8x1xf32>
    %70 = vector.broadcast %69 : vector<8x1xf32> to vector<8x8xf32>
    %71 = arith.mulf %66, %70 : vector<8x8xf32>
    %72 = arith.truncf %71 : vector<8x8xf32> to vector<8x8xbf16>
    %73 = vector.extract_strided_slice %15 {offsets = [0, 16], sizes = [8, 8], strides = [1, 1]} : vector<8x32xbf16> to vector<8x8xbf16>
    %cst_29 = arith.constant dense<0.000000e+00> : vector<8x8xf32>
    %74 = tpu.matmul %72, %73, %cst_29 {dimension_numbers = #tpu.dot_dimension_numbers<[1], [0], [0], [1], [0, 0, 1, 1], [], []>} : vector<8x8xbf16>, vector<8x8xbf16>, vector<8x8xf32> -> vector<8x8xf32>
    %75 = arith.truncf %74 : vector<8x8xf32> to vector<8x8xbf16>
    %c0_30 = arith.constant 0 : index
    %c16 = arith.constant 16 : index
    %76 = vector.load %arg24[%c0_30, %c16] : memref<8x32xbf16, #tpu.memory_space<vmem>>, vector<8x8xbf16>
    tpu.vector_store %arg24[%c0_30, %c16], %75 {strides = array<i32>} : memref<8x32xbf16, #tpu.memory_space<vmem>>, vector<8x8xbf16>,
    %77 = vector.extract_strided_slice %13 {offsets = [0, 24], sizes = [8, 8], strides = [1, 1]} : vector<8x32xbf16> to vector<8x8xbf16>
    %78 = vector.extract_strided_slice %14 {offsets = [0, 24], sizes = [8, 8], strides = [1, 1]} : vector<8x32xbf16> to vector<8x8xbf16>
    %cst_31 = arith.constant dense<0.000000e+00> : vector<8x8xf32>
    %79 = tpu.matmul %77, %78, %cst_31 {dimension_numbers = #tpu.dot_dimension_numbers<[1], [1], [0], [0], [0, 0, 1, 0], [], []>} : vector<8x8xbf16>, vector<8x8xbf16>, vector<8x8xf32> -> vector<8x8xf32>
    %80 = arith.addf %79, %19 : vector<8x8xf32>
    %cst_32 = arith.constant dense<0xFF800000> : vector<8xf32>
    %81 = vector.multi_reduction <maximumf>, %80, %cst_32 [1] : vector<8x8xf32> to vector<8xf32>
    %82 = vector.shape_cast %81 : vector<8xf32> to vector<8x1xf32>
    %83 = vector.broadcast %82 : vector<8x1xf32> to vector<8x8xf32>
    %84 = arith.subf %80, %83 : vector<8x8xf32>
    %85 = math.exp %84 : vector<8x8xf32>
    %cst_33 = arith.constant dense<0.000000e+00> : vector<8xf32>
    %86 = vector.multi_reduction <add>, %85, %cst_33 [1] : vector<8x8xf32> to vector<8xf32>
    %87 = vector.shape_cast %86 : vector<8xf32> to vector<8x1xf32>
    %88 = tpu.reciprocal %87 {approx = true} : vector<8x1xf32> -> vector<8x1xf32>
    %89 = vector.broadcast %88 : vector<8x1xf32> to vector<8x8xf32>
    %90 = arith.mulf %85, %89 : vector<8x8xf32>
    %91 = arith.truncf %90 : vector<8x8xf32> to vector<8x8xbf16>
    %92 = vector.extract_strided_slice %15 {offsets = [0, 24], sizes = [8, 8], strides = [1, 1]} : vector<8x32xbf16> to vector<8x8xbf16>
    %cst_34 = arith.constant dense<0.000000e+00> : vector<8x8xf32>
    %93 = tpu.matmul %91, %92, %cst_34 {dimension_numbers = #tpu.dot_dimension_numbers<[1], [0], [0], [1], [0, 0, 1, 1], [], []>} : vector<8x8xbf16>, vector<8x8xbf16>, vector<8x8xf32> -> vector<8x8xf32>
    %94 = arith.truncf %93 : vector<8x8xf32> to vector<8x8xbf16>
    %c0_35 = arith.constant 0 : index
    %c24 = arith.constant 24 : index
    %95 = vector.load %arg24[%c0_35, %c24] : memref<8x32xbf16, #tpu.memory_space<vmem>>, vector<8x8xbf16>
    tpu.vector_store %arg24[%c0_35, %c24], %94 {strides = array<i32>} : memref<8x32xbf16, #tpu.memory_space<vmem>>, vector<8x8xbf16>,
    %c0_36 = arith.constant 0 : index
    %c0_37 = arith.constant 0 : index
    %96 = vector.load %arg24[%c0_36, %c0_37] : memref<8x32xbf16, #tpu.memory_space<vmem>>, vector<8x32xbf16>
    %c0_38 = arith.constant 0 : index
    %c0_39 = arith.constant 0 : index
    %97 = vector.load %arg11[%c0_38, %c0_39] : memref<32x32xbf16, #tpu.memory_space<vmem>>, vector<32x32xbf16>
    %cst_40 = arith.constant dense<0.000000e+00> : vector<8x32xf32>
    %98 = tpu.matmul %96, %97, %cst_40 {dimension_numbers = #tpu.dot_dimension_numbers<[1], [0], [0], [1], [0, 0, 1, 1], [], []>} : vector<8x32xbf16>, vector<32x32xbf16>, vector<8x32xf32> -> vector<8x32xf32>
    %c0_41 = arith.constant 0 : index
    %c0_42 = arith.constant 0 : index
    %99 = vector.load %arg12[%c0_41, %c0_42] : memref<1x32xf32, #tpu.memory_space<vmem>>, vector<1x32xf32>
    %100 = vector.broadcast %99 : vector<1x32xf32> to vector<8x32xf32>
    %101 = arith.addf %98, %100 : vector<8x32xf32>
    %102 = arith.addf %101, %5 : vector<8x32xf32>
    %c0_43 = arith.constant 0 : index
    %c0_44 = arith.constant 0 : index
    %103 = vector.load %arg13[%c0_43, %c0_44] : memref<1x32xf32, #tpu.memory_space<vmem>>, vector<1x32xf32>
    %c0_45 = arith.constant 0 : index
    %c0_46 = arith.constant 0 : index
    %104 = vector.load %arg14[%c0_45, %c0_46] : memref<1x32xf32, #tpu.memory_space<vmem>>, vector<1x32xf32>
    %cst_47 = arith.constant dense<0.000000e+00> : vector<8xf32>
    %105 = vector.multi_reduction <add>, %102, %cst_47 [1] : vector<8x32xf32> to vector<8xf32>
    %106 = vector.shape_cast %105 : vector<8xf32> to vector<8x1xf32>
    %cst_48 = arith.constant 3.200000e+01 : f32
    %107 = vector.broadcast %cst_48 : f32 to vector<8x1xf32>
    %108 = arith.divf %106, %107 : vector<8x1xf32>
    %109 = vector.broadcast %108 : vector<8x1xf32> to vector<8x32xf32>
    %110 = arith.subf %102, %109 : vector<8x32xf32>
    %111 = arith.mulf %110, %110 : vector<8x32xf32>
    %cst_49 = arith.constant dense<0.000000e+00> : vector<8xf32>
    %112 = vector.multi_reduction <add>, %111, %cst_49 [1] : vector<8x32xf32> to vector<8xf32>
    %113 = vector.shape_cast %112 : vector<8xf32> to vector<8x1xf32>
    %cst_50 = arith.constant 3.200000e+01 : f32
    %114 = vector.broadcast %cst_50 : f32 to vector<8x1xf32>
    %115 = arith.divf %113, %114 : vector<8x1xf32>
    %116 = vector.broadcast %108 : vector<8x1xf32> to vector<8x32xf32>
    %117 = arith.subf %102, %116 : vector<8x32xf32>
    %cst_51 = arith.constant 9.99999996E-13 : f32
    %118 = vector.broadcast %cst_51 : f32 to vector<8x1xf32>
    %119 = arith.addf %115, %118 : vector<8x1xf32>
    %120 = math.rsqrt %119 : vector<8x1xf32>
    %121 = vector.broadcast %120 : vector<8x1xf32> to vector<8x32xf32>
    %122 = arith.mulf %117, %121 : vector<8x32xf32>
    %123 = vector.broadcast %103 : vector<1x32xf32> to vector<8x32xf32>
    %124 = arith.mulf %123, %122 : vector<8x32xf32>
    %125 = vector.broadcast %104 : vector<1x32xf32> to vector<8x32xf32>
    %126 = arith.addf %124, %125 : vector<8x32xf32>
    %127 = arith.truncf %126 : vector<8x32xf32> to vector<8x32xbf16>
    %c0_52 = arith.constant 0 : index
    %c0_53 = arith.constant 0 : index
    %128 = vector.load %arg15[%c0_52, %c0_53] : memref<32x64xbf16, #tpu.memory_space<vmem>>, vector<32x64xbf16>
    %c0_54 = arith.constant 0 : index
    %c0_55 = arith.constant 0 : index
    %129 = vector.load %arg17[%c0_54, %c0_55] : memref<64x32xbf16, #tpu.memory_space<vmem>>, vector<64x32xbf16>
    %c0_56 = arith.constant 0 : index
    %c0_57 = arith.constant 0 : index
    %130 = vector.load %arg16[%c0_56, %c0_57] : memref<1x64xf32, #tpu.memory_space<vmem>>, vector<1x64xf32>
    %cst_58 = arith.constant 0.000000e+00 : f32
    %131 = vector.broadcast %cst_58 : f32 to vector<8x32xf32>
    %cst_59 = arith.constant dense<0.000000e+00> : vector<8x64xf32>
    %132 = tpu.matmul %127, %128, %cst_59 {dimension_numbers = #tpu.dot_dimension_numbers<[1], [0], [0], [1], [0, 0, 1, 1], [], []>} : vector<8x32xbf16>, vector<32x64xbf16>, vector<8x64xf32> -> vector<8x64xf32>
    %133 = vector.broadcast %130 : vector<1x64xf32> to vector<8x64xf32>
    %134 = arith.addf %132, %133 : vector<8x64xf32>
    %cst_60 = arith.constant 5.000000e-01 : f32
    %135 = vector.broadcast %cst_60 : f32 to vector<8x64xf32>
    %136 = arith.mulf %134, %135 : vector<8x64xf32>
    %cst_61 = arith.constant 0.707106769 : f32
    %137 = vector.broadcast %cst_61 : f32 to vector<8x64xf32>
    %138 = arith.mulf %134, %137 : vector<8x64xf32>
    %139 = math.erf %138 : vector<8x64xf32>
    %cst_62 = arith.constant 1.000000e+00 : f32
    %140 = vector.broadcast %cst_62 : f32 to vector<8x64xf32>
    %141 = arith.addf %140, %139 : vector<8x64xf32>
    %142 = arith.mulf %136, %141 : vector<8x64xf32>
    %143 = arith.truncf %142 : vector<8x64xf32> to vector<8x64xbf16>
    %cst_63 = arith.constant dense<0.000000e+00> : vector<8x32xf32>
    %144 = tpu.matmul %143, %129, %cst_63 {dimension_numbers = #tpu.dot_dimension_numbers<[1], [0], [0], [1], [0, 0, 1, 1], [], []>} : vector<8x64xbf16>, vector<64x32xbf16>, vector<8x32xf32> -> vector<8x32xf32>
    %145 = arith.addf %131, %144 : vector<8x32xf32>
    %c0_64 = arith.constant 0 : index
    %c0_65 = arith.constant 0 : index
    %146 = vector.load %arg18[%c0_64, %c0_65] : memref<1x32xf32, #tpu.memory_space<vmem>>, vector<1x32xf32>
    %147 = vector.broadcast %146 : vector<1x32xf32> to vector<8x32xf32>
    %148 = arith.addf %145, %147 : vector<8x32xf32>
    %149 = arith.addf %148, %126 : vector<8x32xf32>
    %c0_66 = arith.constant 0 : index
    %c0_67 = arith.constant 0 : index
    %150 = vector.load %arg19[%c0_66, %c0_67] : memref<1x32xf32, #tpu.memory_space<vmem>>, vector<1x32xf32>
    %c0_68 = arith.constant 0 : index
    %c0_69 = arith.constant 0 : index
    %151 = vector.load %arg20[%c0_68, %c0_69] : memref<1x32xf32, #tpu.memory_space<vmem>>, vector<1x32xf32>
    %cst_70 = arith.constant dense<0.000000e+00> : vector<8xf32>
    %152 = vector.multi_reduction <add>, %149, %cst_70 [1] : vector<8x32xf32> to vector<8xf32>
    %153 = vector.shape_cast %152 : vector<8xf32> to vector<8x1xf32>
    %cst_71 = arith.constant 3.200000e+01 : f32
    %154 = vector.broadcast %cst_71 : f32 to vector<8x1xf32>
    %155 = arith.divf %153, %154 : vector<8x1xf32>
    %156 = vector.broadcast %155 : vector<8x1xf32> to vector<8x32xf32>
    %157 = arith.subf %149, %156 : vector<8x32xf32>
    %158 = arith.mulf %157, %157 : vector<8x32xf32>
    %cst_72 = arith.constant dense<0.000000e+00> : vector<8xf32>
    %159 = vector.multi_reduction <add>, %158, %cst_72 [1] : vector<8x32xf32> to vector<8xf32>
    %160 = vector.shape_cast %159 : vector<8xf32> to vector<8x1xf32>
    %cst_73 = arith.constant 3.200000e+01 : f32
    %161 = vector.broadcast %cst_73 : f32 to vector<8x1xf32>
    %162 = arith.divf %160, %161 : vector<8x1xf32>
    %163 = vector.broadcast %155 : vector<8x1xf32> to vector<8x32xf32>
    %164 = arith.subf %149, %163 : vector<8x32xf32>
    %cst_74 = arith.constant 9.99999996E-13 : f32
    %165 = vector.broadcast %cst_74 : f32 to vector<8x1xf32>
    %166 = arith.addf %162, %165 : vector<8x1xf32>
    %167 = math.rsqrt %166 : vector<8x1xf32>
    %168 = vector.broadcast %167 : vector<8x1xf32> to vector<8x32xf32>
    %169 = arith.mulf %164, %168 : vector<8x32xf32>
    %170 = vector.broadcast %150 : vector<1x32xf32> to vector<8x32xf32>
    %171 = arith.mulf %170, %169 : vector<8x32xf32>
    %172 = vector.broadcast %151 : vector<1x32xf32> to vector<8x32xf32>
    %173 = arith.addf %171, %172 : vector<8x32xf32>
    %174 = arith.truncf %173 : vector<8x32xf32> to vector<8x32xbf16>
    %c0_75 = arith.constant 0 : index
    %c0_76 = arith.constant 0 : index
    %c0_77 = arith.constant 0 : index
    %175 = vector.load %arg21[%c0_75, %c0_76, %c0_77] : memref<1x8x32xbf16, #tpu.memory_space<vmem>>, vector<1x8x32xbf16>
    %176 = vector.shape_cast %175 : vector<1x8x32xbf16> to vector<8x32xbf16>
    %177 = vector.shape_cast %174 : vector<8x32xbf16> to vector<1x8x32xbf16>
    tpu.vector_store %arg21[%c0_75, %c0_76, %c0_77], %177 {strides = array<i32>} : memref<1x8x32xbf16, #tpu.memory_space<vmem>>, vector<1x8x32xbf16>,
    return
  }
  func.func @transform_0(%arg0: i32, %arg1: i32) -> (i32, i32, i32) {
    %c0_i32 = arith.constant 0 : i32
    %c0_i32_0 = arith.constant 0 : i32
    return %arg0, %arg1, %c0_i32 : i32, i32, i32
  }
  func.func @transform_1(%arg0: i32, %arg1: i32) -> (i32, i32, i32) {
    %c0_i32 = arith.constant 0 : i32
    %c0_i32_0 = arith.constant 0 : i32
    %c0_i32_1 = arith.constant 0 : i32
    return %arg0, %c0_i32, %c0_i32_0 : i32, i32, i32
  }
  func.func @transform_2(%arg0: i32, %arg1: i32) -> (i32, i32, i32) {
    %c0_i32 = arith.constant 0 : i32
    %c0_i32_0 = arith.constant 0 : i32
    %c0_i32_1 = arith.constant 0 : i32
    return %arg0, %c0_i32, %c0_i32_0 : i32, i32, i32
  }
  func.func @transform_3(%arg0: i32, %arg1: i32) -> (i32, i32) {
    %c0_i32 = arith.constant 0 : i32
    %c0_i32_0 = arith.constant 0 : i32
    %c0_i32_1 = arith.constant 0 : i32
    return %c0_i32, %c0_i32_0 : i32, i32
  }
  func.func @transform_4(%arg0: i32, %arg1: i32) -> (i32, i32) {
    %c0_i32 = arith.constant 0 : i32
    %c0_i32_0 = arith.constant 0 : i32
    %c0_i32_1 = arith.constant 0 : i32
    return %c0_i32, %c0_i32_0 : i32, i32
  }
  func.func @transform_5(%arg0: i32, %arg1: i32) -> (i32, i32) {
    %c0_i32 = arith.constant 0 : i32
    %c0_i32_0 = arith.constant 0 : i32
    %c0_i32_1 = arith.constant 0 : i32
    return %c0_i32, %c0_i32_0 : i32, i32
  }
  func.func @transform_6(%arg0: i32, %arg1: i32) -> (i32, i32) {
    %c0_i32 = arith.constant 0 : i32
    %c0_i32_0 = arith.constant 0 : i32
    %c0_i32_1 = arith.constant 0 : i32
    return %c0_i32, %c0_i32_0 : i32, i32
  }
  func.func @transform_7(%arg0: i32, %arg1: i32) -> (i32, i32) {
    %c0_i32 = arith.constant 0 : i32
    %c0_i32_0 = arith.constant 0 : i32
    %c0_i32_1 = arith.constant 0 : i32
    return %c0_i32, %c0_i32_0 : i32, i32
  }
  func.func @transform_8(%arg0: i32, %arg1: i32) -> (i32, i32) {
    %c0_i32 = arith.constant 0 : i32
    %c0_i32_0 = arith.constant 0 : i32
    %c0_i32_1 = arith.constant 0 : i32
    return %c0_i32, %c0_i32_0 : i32, i32
  }
  func.func @transform_9(%arg0: i32, %arg1: i32) -> (i32, i32) {
    %c0_i32 = arith.constant 0 : i32
    %c0_i32_0 = arith.constant 0 : i32
    %c0_i32_1 = arith.constant 0 : i32
    return %c0_i32, %c0_i32_0 : i32, i32
  }
  func.func @transform_10(%arg0: i32, %arg1: i32) -> (i32, i32) {
    %c0_i32 = arith.constant 0 : i32
    %c0_i32_0 = arith.constant 0 : i32
    %c0_i32_1 = arith.constant 0 : i32
    return %c0_i32, %c0_i32_0 : i32, i32
  }
  func.func @transform_11(%arg0: i32, %arg1: i32) -> (i32, i32) {
    %c0_i32 = arith.constant 0 : i32
    %c0_i32_0 = arith.constant 0 : i32
    %c0_i32_1 = arith.constant 0 : i32
    return %c0_i32, %c0_i32_0 : i32, i32
  }
  func.func @transform_12(%arg0: i32, %arg1: i32) -> (i32, i32) {
    %c0_i32 = arith.constant 0 : i32
    %c0_i32_0 = arith.constant 0 : i32
    %c0_i32_1 = arith.constant 0 : i32
    return %c0_i32, %c0_i32_0 : i32, i32
  }
  func.func @transform_13(%arg0: i32, %arg1: i32) -> (i32, i32) {
    %c0_i32 = arith.constant 0 : i32
    %c0_i32_0 = arith.constant 0 : i32
    %c0_i32_1 = arith.constant 0 : i32
    return %c0_i32, %c0_i32_0 : i32, i32
  }
  func.func @transform_14(%arg0: i32, %arg1: i32) -> (i32, i32) {
    %c0_i32 = arith.constant 0 : i32
    %c0_i32_0 = arith.constant 0 : i32
    %c0_i32_1 = arith.constant 0 : i32
    return %c0_i32, %c0_i32_0 : i32, i32
  }
  func.func @transform_15(%arg0: i32, %arg1: i32) -> (i32, i32) {
    %c0_i32 = arith.constant 0 : i32
    %c0_i32_0 = arith.constant 0 : i32
    %c0_i32_1 = arith.constant 0 : i32
    return %c0_i32, %c0_i32_0 : i32, i32
  }
  func.func @transform_16(%arg0: i32, %arg1: i32) -> (i32, i32) {
    %c0_i32 = arith.constant 0 : i32
    %c0_i32_0 = arith.constant 0 : i32
    %c0_i32_1 = arith.constant 0 : i32
    return %c0_i32, %c0_i32_0 : i32, i32
  }
  func.func @transform_17(%arg0: i32, %arg1: i32) -> (i32, i32) {
    %c0_i32 = arith.constant 0 : i32
    %c0_i32_0 = arith.constant 0 : i32
    %c0_i32_1 = arith.constant 0 : i32
    return %c0_i32, %c0_i32_0 : i32, i32
  }
  func.func @transform_18(%arg0: i32, %arg1: i32) -> (i32, i32) {
    %c0_i32 = arith.constant 0 : i32
    %c0_i32_0 = arith.constant 0 : i32
    %c0_i32_1 = arith.constant 0 : i32
    return %c0_i32, %c0_i32_0 : i32, i32
  }
  func.func @transform_19(%arg0: i32, %arg1: i32) -> (i32, i32, i32) {
    %c0_i32 = arith.constant 0 : i32
    %c0_i32_0 = arith.constant 0 : i32
    return %arg0, %arg1, %c0_i32 : i32, i32, i32
  }
}

</mosaic_0001>

<bundles_post_ra>
// kernel: tpu_custom_call.1
= control target key start
LH: loop header
LB: loop body
LE: loop exit
PB: predicated region body
PF: predicated region fallthrough
CT: control target
= control target key end

     0   :  { %s3079_s0 = inlined_call_operand.hbm [shape: bf16[2,8,32], index: 0, kind: input, shape index: {}]   ;;  %s3080_s1 = inlined_call_operand.hbm [shape: bf16[2,8,32], index: 1, kind: input, shape index: {}]   ;;  %s3081_s2 = inlined_call_operand.hbm [shape: f32[2,1,8], index: 2, kind: input, shape index: {}]   ;;  %s3082_s3 = inlined_call_operand.vmem [shape: bf16[32,32], index: 3, kind: input, shape index: {}]   ;;  %s3083_s4 = inlined_call_operand.hbm [shape: f32[1,32], index: 4, kind: input, shape index: {}]   ;;  %s3084_s5 = inlined_call_operand.vmem [shape: bf16[32,32], index: 5, kind: input, shape index: {}]   ;;  %s3085_s6 = inlined_call_operand.hbm [shape: f32[1,32], index: 6, kind: input, shape index: {}]   ;;  %s3086_s7 = inlined_call_operand.vmem [shape: bf16[32,32], index: 7, kind: input, shape index: {}]   ;;  %s3087_s8 = inlined_call_operand.hbm [shape: f32[1,32], index: 8, kind: input, shape index: {}]   ;;  %s3088_s9 = inlined_call_operand.vmem [shape: bf16[32,32], index: 9, kind: input, shape index: {}]   ;;  %s3089_s10 = inlined_call_operand.vmem [shape: f32[1,32], index: 10, kind: input, shape index: {}]   ;;  %s3090_s11 = inlined_call_operand.vmem [shape: f32[1,32], index: 11, kind: input, shape index: {}]   ;;  %s3091_s12 = inlined_call_operand.vmem [shape: f32[1,32], index: 12, kind: input, shape index: {}]   ;;  %s3092_s13 = inlined_call_operand.hbm [shape: bf16[32,64], index: 13, kind: input, shape index: {}]   ;;  %s3093_s14 = inlined_call_operand.vmem [shape: f32[1,64], index: 14, kind: input, shape index: {}]   ;;  %s3094_s15 = inlined_call_operand.vmem [shape: bf16[64,32], index: 15, kind: input, shape index: {}]   ;;  %s3095_s16 = inlined_call_operand.vmem [shape: f32[1,32], index: 16, kind: input, shape index: {}]   ;;  %s3096_s17 = inlined_call_operand.vmem [shape: f32[1,32], index: 17, kind: input, shape index: {}]   ;;  %s3097_s18 = inlined_call_operand.vmem [shape: f32[1,32], index: 18, kind: input, shape index: {}]   ;;  %s3098_s19 = inlined_call_operand.hbm [shape: bf16[2,8,32], index: 19, kind: output, shape index: {}]  }
   0x1   :  { %3116 = sst [smem:[#allocation31_spill]] %s3079_s0 }
   0x2   :  { %3117 = sst [smem:[#allocation32_spill]] %s3080_s1 }
   0x3   :  { %3118 = sst [smem:[#allocation33_spill]] %s3081_s2 }
   0x4   :  { %3119 = sst [smem:[#allocation34_spill]] %s3082_s3 }
   0x5   :  { %3120 = sst [smem:[#allocation35_spill]] %s3083_s4 }
   0x6   :  { %3121 = sst [smem:[#allocation36_spill]] %s3085_s6 }
   0x7   :  { %3122 = sst [smem:[#allocation37_spill]] %s3087_s8 }
   0x8   :  { %3123 = sst [smem:[#allocation38_spill]] %s3091_s12 }
   0x9   :  { %3124 = sst [smem:[#allocation39_spill]] %s3093_s14 }
   0xa   :  { %3125 = sst [smem:[#allocation40_spill]] %s3094_s15 }
   0xb   :  { %3126 = sst [smem:[#allocation41_spill]] %s3095_s16 }
   0xc   :  { %3127 = sst [smem:[#allocation42_spill]] %s3096_s17 }
   0xd   :  { %3128 = sst [smem:[#allocation43_spill]] %s3097_s18 }
   0xe   :  { %3129 = sst [smem:[#allocation44_spill]] %s3098_s19 }
   0xf   :  { %24 = vsyncpa [#allocation6], 0 }
  0x10   :  { %26 = vsyncpa [#allocation6 + $0x1], 0 }
  0x11   :  { %27 = vsyncpa [#allocation9], 0 }
  0x12   :  { %29 = vsyncpa [#allocation9 + $0x1], 0 }
  0x13   :  { %30 = vsyncpa [#allocation12], 0 }
  0x14   :  { %31 = vsyncpa [#allocation15], 0 }
  0x15   :  { %32 = vsyncpa [#allocation7], 0 }
  0x16   :  { %34 = vsyncpa [#allocation7 + $0x1], 0  ;;  %s2678_s0 = smov 0   ;;  %s2680_s30 = smov 0  }
  0x17   :  { %s2682_s20 = smov 0   ;;  %s2684_s21 = smov 0  }
  0x18   :  { %s2686_s1 = smov 0   ;;  %s2688_s22 = smov 0  }
  0x19 LB: > { %3130 = sst [smem:[#allocation23_spill]] %s2538_s0  ;;  %s2709_s2 = sadd.s32 4294967295, %s2558_s22   ;;  %s2558_s22 = sphi %s2688_s22, %s40_s22   ;;  %s2554_s1 = sphi %s2686_s1, %s3184_s1   ;;  %s2550_s21 = sphi %s2684_s21, %s3183_s21   ;;  %s2546_s20 = sphi %s2682_s20, %s3179_s20   ;;  %s2542_s30 = sphi %s2680_s30, %s3182_s30   ;;  %s2538_s0 = sphi %s2678_s0, %s3181_s0  }
  0x1a   : > { %3131 = sst [smem:[#allocation24_spill]] %s2546_s20  ;;  %p1911_p0 = scmp.ge.s32.totalorder %s2558_s22, 1 }
  0x1b   : > { %3132 = sst [smem:[#allocation25_spill]] %s2550_s21  ;;  %p3101_p1 = scmp.eq.s32.totalorder %s2709_s2, 0 }
  0x1c   : > { %3133 = sst [smem:[#allocation26_spill]] %s2558_s22  ;;  %p501_p2 = scmp.lt.s32.totalorder %s2558_s22, 3 }
  0x1d   : > { %s2560_s24 = smov [#allocation11]   ;;  %s2561_s3 = smov [#allocation14]  }
  0x1e   : > { %p2714_p3 = pnand %p1911_p0, %p501_p2  ;;  %s517_s25 = sshll.u32 %s2560_s24, 4  ;;  %s518_s25 = int_to_ptr.vmem [resolvable:$true] %s517_s25 }
  0x1f   : > { %s545_s26 = sshll.u32 %s2561_s3, 4  ;;  %s2289_s28 = scalar_lea.vmem %s518_s25, 16  ;;  %s546_s26 = int_to_ptr.vmem [resolvable:$true] %s545_s26 }
  0x20   : > { %s3134_s23 = scalar_select %p2714_p3, 1, 0 }
  0x21   : > { %p2141_p5 = pneg %p2714_p3  ;;  %p2290_p8 = scmp.ne.s32.totalorder %s518_s25, %s2289_s28 }
  0x22   : > { %s2296_s29 = scalar_lea.vmem %s518_s25, 32  ;;  %p2297_p11 = scmp.lt.s32.totalorder %s518_s25, %s518_s25 }
  0x23   : > { %p2723_p6 = pnand %p2141_p5, %p3101_p1  ;;  %p2298_p12 = scmp.lt.s32.totalorder %s2296_s29, %s2289_s28 }
  0x25   : > { %p3110_p7 = pneg %p2723_p6  ;;  %p2299_p13 = por %p2298_p12, %p2297_p11 }
  0x27   : > { %p2292_p9 = pnand %p2290_p8, %p3110_p7 }
  0x29   : > { %p2293_p10 = pneg %p2292_p9 }
  0x2b   : > { %p2300_p0 = pnand %p2299_p13, %p2293_p10 }
  0x2d   : > { %2303 = shalt.err (!%p2300_p0)
}
  0x2e   : > { %s3136_s4 = sld [smem:[#allocation35_spill]]  ;;  %s2315_s19 = scalar_lea.vmem %s546_s26, 16 }
  0x2f   : > { %p2316_p2 = scmp.ne.s32.totalorder %s546_s26, %s2315_s19  ;;  %s2322_s18 = scalar_lea.vmem %s546_s26, 32 }
  0x30   : > { %p2323_p9 = scmp.lt.s32.totalorder %s546_s26, %s546_s26  ;;  %p2324_p4 = scmp.lt.s32.totalorder %s2322_s18, %s2315_s19 }
  0x31   : > { %p2318_p5 = pnand %p2316_p2, %p3110_p7 }
  0x32   : > { %p2325_p1 = por %p2324_p4, %p2323_p9 }
  0x33   : > { %p2319_p8 = pneg %p2318_p5 }
  0x34   : > { %2144 = dma.hbm_to_vmem [thread:$0]  (!%p2723_p6), %s3136_s4, 16, %s518_s25, [#allocation12]  }
  0x35   : > { %p2326_p11 = pnand %p2325_p1, %p2319_p8 }
  0x37   : > { %2329 = shalt.err (!%p2326_p11)
}
  0x38   : > { %s3137_s8 = sld [smem:[#allocation37_spill]]  ;;  %s1910_s18 = sadd.s32 4294967294, %s2558_s22  }
  0x39   : > { %s52_s19 = sadd.s32 1, %s2554_s1  ;;  %s61_s25 = sadd.s32 1, %s2546_s20 }
  0x3a   : > { %p54_p1 = scmp.ge.s32.totalorder %s52_s19, 2  ;;  %p68_p4 = scmp.ne.s32.totalorder %s2546_s20, %s2542_s30 }
  0x3b   : > { %p69_p10 = scmp.eq.s32.totalorder %s2558_s22, 0  ;;  %p74_p13 = scmp.ne.s32.totalorder %s2542_s30, %s2538_s0 }
  0x3c   : > { %s3186_s19 = smov (%p54_p1, %s52_s19), 0  ;;  %p488_p0 = scmp.eq.s32.totalorder %s2709_s2, 1 }
  0x3d   : > { %3138 = sst [smem:[#allocation27_spill]] %s3186_s19  ;;  %p2753_p12 = por %p69_p10, %p68_p4 }
  0x3e   : > { %2150 = dma.hbm_to_vmem [thread:$0]  (!%p2723_p6), %s3137_s8, 16, %s546_s26, [#allocation15]  }
  0x3f   : > { %s56_s26 = ssub.s32 %s2554_s1, %s3186_s19  ;;  %p3140_p5 = scmp.eq.s32.totalorder %s2709_s2, 0 }
  0x40   : > { %p59_p2 = scmp.eq.s32.totalorder %s56_s26, 0  ;;  %p2768_p9 = por %p488_p0, %p68_p4 }
  0x41   : > { %p2764_p8 = por %p3140_p5, %p74_p13  ;;  %p494_p11 = scmp.eq.s32.totalorder %s1910_s18, 1 }
  0x42   : > { %s3142_s28 = scalar_select %p2768_p9, 1, 0 }
  0x43   : > { %s3141_s3 = scalar_select %p2764_p8, 1, 0 }
  0x44   : > { %3143 = sst [smem:[#allocation28_spill]] %s3142_s28  ;;  %p2775_p1 = por %p494_p11, %p74_p13 }
  0x45   : > { %s2773_s29 = scalar_select %p59_p2, %s2546_s20, %s61_s25  }
  0x46   : > { %s3145_s4 = scalar_select %p2775_p1, 1, 0 }
  0x47   : > { %3144 = sst [smem:[#allocation29_spill]] %s2773_s29  ;;  %p2172_p10 = scmp.lt.s32.totalorder %s2558_s22, 2 }
  0x48   : > { %3146 = sst [smem:[#allocation30_spill]] %s3145_s4  ;;  %s2781_s8 = sand.u32 1, %s2546_s20  }
  0x49   : > { %s1918_s26 = sshll.u32 %s2554_s1, 6  ;;  %s1917_s19 = sshll.u32 %s2781_s8, 2 }
  0x4a   : > { %p2787_p5 = pnand %p2172_p10, %p2753_p12  ;;  %s615_s18 = sand.u32 1, %s2558_s22  }
  0x4b   : > { %s3148_s28 = sld [smem:[#allocation32_spill]]  ;;  %s619_s20 = scalar_lea.vmem [#allocation8], %s1917_s19 }
  0x4c   : > { %s626_s17 = sshll.u32 %s619_s20, 4  ;;  %s2799_s21 = scalar_lea.sflag [#allocation9], %s615_s18  ;;  %s627_s17 = int_to_ptr.vmem [resolvable:$true] %s626_s17 }
  0x4d   : > { %p3111_p4 = pneg %p2787_p5  ;;  %s2343_s24 = scalar_lea.vmem %s627_s17, 64 }
  0x4e   : > { %p2344_p12 = scmp.ne.s32.totalorder %s627_s17, %s2343_s24  ;;  %s2562_s22 = smov [#allocation8]  }
  0x4f   : > { %s2348_s16 = sshll.u32 %s2562_s22, 4  ;;  %s2349_s16 = int_to_ptr.vmem [resolvable:$false] %s2348_s16 }
  0x50   : > { %p2346_p13 = pnand %p2344_p12, %p3111_p4  ;;  %s2350_s14 = scalar_lea.vmem %s2349_s16, 128 }
  0x51   : > { %s624_s4 = scalar_lea.hbm %s3148_s28, %s1918_s26  ;;  %p2351_p2 = scmp.lt.s32.totalorder %s627_s17, %s2349_s16 }
  0x52   : > { %p2347_p0 = pneg %p2346_p13  ;;  %p2352_p11 = scmp.lt.s32.totalorder %s2350_s14, %s2343_s24 }
  0x54   : > { %p2353_p10 = por %p2352_p11, %p2351_p2 }
  0x56   : > { %p2354_p7 = pnand %p2353_p10, %p2347_p0 }
  0x58   : > { %2357 = shalt.err (!%p2354_p7)
}
  0x59   : > { %2160 = dma.hbm_to_vmem [thread:$0]  (!%p2787_p5), %s624_s4, 64, %s627_s17, %s2799_s21  }
  0x5a   : > { %s2563_s20 = smov [#allocation13]   ;;  %s2564_s29 = smov [#allocation16]  }
  0x5b   : > { %s531_s28 = sshll.u32 %s2563_s20, 4  ;;  %s567_s18 = sshll.u32 %s2564_s29, 4  ;;  %s532_s28 = int_to_ptr.vmem [resolvable:$true] %s531_s28  ;;  %s568_s18 = int_to_ptr.vmem [resolvable:$true] %s567_s18 }
  0x5c   : > { %s2369_s25 = scalar_lea.vmem %s532_s28, 16  ;;  %p3149_p13 = pneg %p2723_p6 }
  0x5d   : > { %p2370_p12 = scmp.ne.s32.totalorder %s532_s28, %s2369_s25  ;;  %s2376_s14 = scalar_lea.vmem %s532_s28, 32 }
  0x5e   : > { %p2377_p2 = scmp.lt.s32.totalorder %s532_s28, %s532_s28  ;;  %p2378_p0 = scmp.lt.s32.totalorder %s2376_s14, %s2369_s25 }
  0x5f   : > { %p2372_p4 = pnand %p2370_p12, %p3149_p13 }
  0x60   : > { %p2379_p7 = por %p2378_p0, %p2377_p2 }
  0x61   : > { %p2373_p1 = pneg %p2372_p4 }
  0x63   : > { %p2380_p11 = pnand %p2379_p7, %p2373_p1 }
  0x65   : > { %2383 = shalt.err (!%p2380_p11)
}
  0x66   : > { %s3150_s6 = sld [smem:[#allocation36_spill]]  ;;  %s2395_s17 = scalar_lea.vmem %s568_s18, 256 }
  0x67   : > { %p2396_p10 = scmp.ne.s32.totalorder %s568_s18, %s2395_s17  ;;  %p3151_p9 = pmov %p3149_p13 }
  0x68   : > { %p2403_p13 = scmp.lt.s32.totalorder %s568_s18, %s568_s18  ;;  %p2404_p8 = scmp.lt.s32.totalorder %s2395_s17, %s2395_s17 }
  0x69   : > { %p2398_p12 = pnand %p2396_p10, %p3151_p9 }
  0x6a   : > { %p2405_p3 = por %p2404_p8, %p2403_p13 }
  0x6b   : > { %p2399_p4 = pneg %p2398_p12 }
  0x6c   : > { %2147 = dma.hbm_to_vmem [thread:$0]  (!%p2723_p6), %s3150_s6, 16, %s532_s28, [#allocation12]  }
  0x6d   : > { %p2406_p2 = pnand %p2405_p3, %p2399_p4 }
  0x6f   : > { %2409 = shalt.err (!%p2406_p2)
}
  0x70   : > { %s2565_s22 = smov 64   ;;  %s2566_s24 = smov 4  }
  0x71   : > { %2153 = dma.hbm_to_vmem [thread:$0]  (!%p2723_p6), %s3092_s13, 256, %s568_s18, [#allocation15], %s2565_s22, %s2565_s22, %s2566_s24  }
  0x72   : > { %s3152_s14 = sld [smem:[#allocation31_spill]]  ;;  %s600_s16 = scalar_lea.vmem [#allocation5], %s1917_s19 }
  0x73   : > { %s608_s17 = sshll.u32 %s600_s16, 4  ;;  %s1921_s6 = sshll.u32 %s2554_s1, 4  ;;  %s609_s17 = int_to_ptr.vmem [resolvable:$true] %s608_s17 }
  0x74   : > { %s597_s15 = scalar_lea.sflag [#allocation6], %s2781_s8  ;;  %s2423_s12 = scalar_lea.vmem %s609_s17, 64 }
  0x75   : > { %p2424_p3 = scmp.ne.s32.totalorder %s609_s17, %s2423_s12  ;;  %p3153_p8 = pneg %p2787_p5 }
  0x76   : > { %s2567_s27 = smov [#allocation5]  }
  0x77   : > { %p2426_p9 = pnand %p2424_p3, %p3153_p8  ;;  %s2428_s20 = sshll.u32 %s2567_s27, 4  ;;  %s2429_s20 = int_to_ptr.vmem [resolvable:$false] %s2428_s20 }
  0x78   : > { %s606_s4 = scalar_lea.hbm %s3152_s14, %s1918_s26  ;;  %s2430_s18 = scalar_lea.vmem %s2429_s20, 128 }
  0x79   : > { %p2427_p1 = pneg %p2426_p9  ;;  %p2431_p6 = scmp.lt.s32.totalorder %s609_s17, %s2429_s20 }
  0x7a   : > { %p2432_p0 = scmp.lt.s32.totalorder %s2430_s18, %s2423_s12 }
  0x7c   : > { %p2433_p7 = por %p2432_p0, %p2431_p6 }
  0x7e   : > { %p2434_p11 = pnand %p2433_p7, %p2427_p1 }
  0x80   : > { %2437 = shalt.err (!%p2434_p11)
}
  0x81   : > { %2157 = dma.hbm_to_vmem [thread:$0]  (!%p2787_p5), %s606_s4, 64, %s609_s17, %s597_s15  }
  0x82   : > { %s3154_s22 = sld [smem:[#allocation33_spill]]  ;;  %s636_s28 = scalar_lea.vmem [#allocation10], %s2781_s8 }
  0x83   : > { %s643_s29 = sshll.u32 %s636_s28, 4  ;;  %p3155_p12 = pmov %p3153_p8  ;;  %s644_s29 = int_to_ptr.vmem [resolvable:$true] %s643_s29 }
  0x84   : > { %s2451_s25 = scalar_lea.vmem %s644_s29, 16  ;;  %s2568_s12 = smov [#allocation10]  }
  0x85   : > { %p2452_p10 = scmp.ne.s32.totalorder %s644_s29, %s2451_s25  ;;  %s2456_s14 = sshll.u32 %s2568_s12, 4  ;;  %s2457_s14 = int_to_ptr.vmem [resolvable:$false] %s2456_s14 }
  0x86   : > { %s2458_s16 = scalar_lea.vmem %s2457_s14, 32  ;;  %p2459_p2 = scmp.lt.s32.totalorder %s644_s29, %s2457_s14 }
  0x87   : > { %p2454_p4 = pnand %p2452_p10, %p3155_p12  ;;  %p2460_p3 = scmp.lt.s32.totalorder %s2458_s16, %s2451_s25 }
  0x88   : > { %s641_s24 = scalar_lea.hbm %s3154_s22, %s1921_s6 }
  0x89   : > { %p2455_p13 = pneg %p2454_p4  ;;  %p2461_p8 = por %p2460_p3, %p2459_p2 }
  0x8b   : > { %p2462_p9 = pnand %p2461_p8, %p2455_p13 }
  0x8d   : > { %2465 = shalt.err (!%p2462_p9)
}
  0x8e   : > { %2163 = dma.hbm_to_vmem [thread:$0]  (!%p2787_p5), %s641_s24, 16, %s644_s29, %s2799_s21  }
  0x8f   : > { %p3156_p1 = scmp.ne.s32.totalorder %s3134_s23, 0 }
  0x90   : > { %s2852_s6 = sand.u32 (!%p3156_p1), 1, %s2542_s30   ;;  %p3157_p6 = scmp.ne.s32.totalorder (!%p3156_p1), %s3141_s3, 0 }
  0x91   : > { %652 = sbr.rel (%p3156_p1) target bundleno = 2588 (0xa1c), region = 96  ;;  %s2855_s8 = sshll.u32 (!%p3156_p1), %s2852_s6, 2 }
  0x92   : > { %s655_s15 = scalar_lea.sflag (!%p3156_p1), [#allocation6], %s2852_s6  ;;  %s658_s4 = scalar_lea.vmem (!%p3156_p1), [#allocation5], %s2855_s8 }
  0x96   : > { %2517 = dma.done.wait (%p3157_p6), %s655_s15, 64  }
  0x97   : > { %2519 = vsyncadd (%p3157_p6), %s655_s15, 4294967232  ;;  %s663_s0 = sand.u32 1, %s2709_s2   ;;  %s667_s23 = scalar_lea.vmem [#allocation8], %s2855_s8 }
  0x98   : > { %s664_s21 = scalar_lea.sflag [#allocation9], %s663_s0 }
  0x99   : > { %2521 = dma.done.wait (%p3157_p6), %s664_s21, 80  }
  0x9a   : > { %2523 = vsyncadd (%p3157_p6), %s664_s21, 4294967216  ;;  %s675_s17 = scalar_lea.vmem [#allocation10], %s2852_s6  ;;  %p3158_p5 = scmp.eq.s32.totalorder %s2709_s2, 0 }
  0x9c   : > { %2525 = dma.done.wait (%p3158_p5), [#allocation12], 32   ;;  %p3159_p0 = pmov %p3158_p5 }
  0x9e   : > { %2527 = vsyncadd (%p3159_p0), [#allocation12], 4294967264  ;;  %p3160_p7 = pmov %p3159_p0 }
  0x9f   : > { %p3161_p11 = pmov %p3159_p0 }
  0xa0   : > { %2529 = dma.done.wait (%p3160_p7), [#allocation15], 272  }
  0xa1   : > { %2531 = vsyncadd (%p3161_p11), [#allocation15], 4294967024  ;;  %v2569_v0 = vmov 0.0   ;;  %vm2570_vm0 = vmmov 0   ;;  %v2240_v1 = vld [vmem:[%s3084_s5 + $0x8] sm:$0xff]   ;;  %v2241_v2 = vld [vmem:[%s3084_s5] sm:$0xff]  }
  0xa2   : > { %2017 = vmatprep.subr.bf16.mxu0 %v2569_v0  ;;  %2021 = vmatprep.mubr.msk.bf16.mxu0 %vm2570_vm0, %v2569_v0  ;;  %v760_v3 = vld [vmem:[%s667_s23] sm:$0xf]  ;;  %vm784_vm1 = vcmask 261120   ;;  %s3162_s26 = sld [smem:[#allocation34_spill]]  ;;  %v2904_v6 = vld [vmem:[%s658_s4] sm:$0xf] }
  0xa3   : > { %2025 = vmatprep.subr.bf16.mxu1 %v2569_v0  ;;  %2029 = vmatprep.mubr.msk.bf16.mxu1 %vm2570_vm0, %v2569_v0  ;;  %v2244_v7 = vld [vmem:[%s3086_s7 + $0x8] sm:$0xff]   ;;  %v2245_v8 = vld [vmem:[%s3086_s7] sm:$0xff]   ;;  %vm892_vm2 = vcmask 257024   ;;  %v1938_v16 = vld [vmem:[#allocation11] ss:$0 sm:$0xff]  ;;  %vm976_vm3 = vcmask 64512  }
  0xa4   : > { %2018 = vmatpush3.bf16.msra.mxu0 %v2240_v1  ;;  %2026 = vmatpush3.bf16.msra.mxu1 %v2244_v7  ;;  %v1930_v9 = vld [vmem:[#allocation13] ss:$0 sm:$0xff]  ;;  %s2571_s14 = smov 112   ;;  %s2572_s16 = smov 120   ;;  %v1934_v27 = vld [vmem:[#allocation14] ss:$0 sm:$0xff] }
  0xa5   : > { %2019 = vmatprep.subr.bf16.mxu0 %v2569_v0  ;;  %2027 = vmatprep.subr.bf16.mxu1 %v2569_v0  ;;  %s2573_s15 = smov 104   ;;  %vm1038_vm4 = vcmask 1043456   ;;  %v1942_v45 = vld [vmem:[%s675_s17] ss:$0 sm:$0xff]  ;;  %vm1083_vm5 = vcmask 60416   ;;  %s2574_s4 = smov 8  }
  0xa6   : > { %s2575_s3 = smov 16   ;;  %s2576_s27 = smov 24   ;;  %vm1209_vm6 = vcmask 126016   ;;  %vm1328_vm7 = vcmask 191616   ;;  %vm1447_vm8 = vcmask 257216   ;;  %vm1659_vm9 = vcmask 523264  }
  0xa7   : > { %s3163_s28 = sld [smem:[#allocation38_spill]]  ;;  %s2577_s2 = smov [#allocation17]  }
  0xa8   : > { %v2242_v4 = vld [vmem:[%s3162_s26 + $0x8] sm:$0xff]   ;;  %2020 = vmatpush3.bf16.msra.mxu0 %v2241_v2  ;;  %v2243_v5 = vld [vmem:[%s3162_s26] sm:$0xff]   ;;  %2028 = vmatpush3.bf16.msra.mxu1 %v2245_v8  ;;  %s3164_s12 = sld [smem:[#allocation40_spill]] }
  0xa9   : > { %2033 = vmatprep.subr.bf16.mxu0 %v2569_v0  ;;  %2041 = vmatprep.subr.bf16.mxu1 %v2569_v0  ;;  %s3166_s20 = sld [smem:[#allocation41_spill]] }
  0xaa   : > { %s3167_s18 = sld [smem:[#allocation25_spill]] }
  0xab   : > { %2022 = vmatmul.mubr.msk.bf16.vlgmr.msra.gmra.mxu0 %vm784_vm1, %v760_v3  ;;  %2030 = vmatmul.mubr.msk.bf16.vlgmr.msra.gmra.mxu1 %vm784_vm1, %v760_v3  ;;  %s3168_s24 = sld [smem:[#allocation42_spill]] }
  0xac   : > { %2034 = vmatpush3.bf16.msra.mxu0 %v2242_v4  ;;  %2037 = vmatprep.mubr.msk.bf16.mxu0 %vm2570_vm0, %v2569_v0  ;;  %s3171_s23 = sld [smem:[#allocation44_spill]] }
  0xad   : > { %2035 = vmatprep.subr.bf16.mxu0 %v2569_v0  ;;  %2043 = vmatprep.mubr.msk.bf16.mxu1 %vm2570_vm0, %v2569_v0 }
  0xb0   : > { %2036 = vmatpush3.bf16.msra.mxu0 %v2243_v5 }
  0xb1   : > { %2047 = vmatprep.subr.bf16.mxu0 %v2569_v0 }
  0xb3   : > { %2038 = vmatmul.mubr.msk.bf16.vlgmr.msra.gmra.mxu0 %vm784_vm1, %v2904_v6 }
  0xb4   : > { %2049 = vmatprep.mubr.msk.bf16.mxu0 %vm2570_vm0, %v2569_v0 }
 0x16b   : > { %v822_v10 = vpop.f32.mrf.mxu0  ;;  %v885_v28 = vpop.f32.mrf.mxu1 }
 0x16c   : > { %v823_v11 = vadd.f32 %v1930_v9, %v822_v10  ;;  %v886_v29 = vadd.f32 %v1934_v27, %v885_v28 }
 0x16d   : > { %v2023_v12 = vpop.f32.mrf.mxu0  ;;  %v2031_v30 = vpop.f32.mrf.mxu1 }
 0x16e   : > { %v891_v13 = vpack.c.bf16 %v823_v11, %v823_v11  ;;  %v894_v31 = vpack.c.bf16 %v886_v29, %v886_v29 }
 0x16f   : > { %v825_v14 = vpop.f32.mrf.mxu0  ;;  %v888_v32 = vpop.f32.mrf.mxu1 }
 0x170   : > { %893 = vst.msk [vmem:[#allocation2] sm:$0xf] %vm892_vm2, %v891_v13  ;;  %895 = vst.msk [vmem:[#allocation3] sm:$0xf] %vm892_vm2, %v894_v31 }
 0x171   : > { %v2024_v15 = vpop.f32.mrf.mxu0  ;;  %v2032_v33 = vpop.f32.mrf.mxu1 }
 0x173   : > { %v959_v17 = vpop.f32.mrf.mxu0 }
 0x174   : > { %v960_v18 = vadd.f32 %v1938_v16, %v959_v17 }
 0x175   : > { %v2039_v19 = vpop.f32.mrf.mxu0 }
 0x176   : > { %v965_v20 = vmul.f32 0.35355338, %v960_v18 }
 0x177   : > { %v962_v21 = vpop.f32.mrf.mxu0  ;;  %v967_v22 = vld [vmem:[#allocation2] sm:$0xf]  ;;  %v968_v34 = vld [vmem:[#allocation3] sm:$0xf] }
 0x178   : > { %v981_v23 = vsel %vm976_vm3, %v967_v22, 0  ;;  %v1945_v24 = vcombine.low %v967_v22, %v967_v22  ;;  %v966_v26 = vpack.c.bf16 %v965_v20, %v965_v20  ;;  %v1040_v35 = vsel %vm1038_vm4, %v968_v34, 0 }
 0x179   : > { %2042 = vmatpush3.bf16.xpose.msra.mxu1 %v981_v23  ;;  %v2040_v25 = vpop.f32.mrf.mxu0  ;;  %2048 = vmatpush3.bf16.msra.mxu0 %v1040_v35  ;;  %v1947_v13 = vcombine.low %v968_v34, %v968_v34 }
 0x17a   : > { %1213 = vrot.lane.b32.xlu1 %v1945_v24, %s2571_s14  ;;  %1091 = vrot.lane.b32.xlu0 %v1945_v24, %s2572_s16 }
 0x17b   : > { %2053 = vmatprep.subr.bf16.mxu1 %v2569_v0  ;;  %2059 = vmatprep.subr.bf16.mxu0 %v2569_v0 }
 0x17e   : > { %1211 = vrot.lane.b32.xlu1 %v966_v26, %s2571_s14  ;;  %1086 = vrot.lane.b32.xlu0 %v966_v26, %s2572_s16 }
 0x180   : > { %2044 = vmatmul.mubr.msk.bf16.vlgmr.msra.gmra.mxu1 %vm976_vm3, %v966_v26 }
 0x181   : > { %2055 = vmatprep.mubr.msk.bf16.mxu1 %vm2570_vm0, %v2569_v0 }
 0x182   : > { %1330 = vrot.lane.b32.xlu1 %v966_v26, %s2573_s15  ;;  %1332 = vrot.lane.b32.xlu0 %v1945_v24, %s2573_s15 }
 0x1ec   : > { %v1092_v36 = vpop.permute.xlu0 %1091  ;;  %v1214_v38 = vpop.permute.xlu1 %1213 }
 0x1ed   : > { %v1097_v37 = vsel %vm976_vm3, %v1092_v36, 0  ;;  %v1219_v40 = vsel %vm976_vm3, %v1214_v38, 0 }
 0x1ee   : > { %2054 = vmatpush3.bf16.xpose.msra.mxu1 %v1097_v37 }
 0x1ef   : > { %2065 = vmatprep.subr.bf16.mxu1 %v2569_v0 }
 0x1f0   : > { %v1087_v39 = vpop.permute.xlu0 %1086  ;;  %v1212_v42 = vpop.permute.xlu1 %1211 }
 0x1f4   : > { %v1333_v41 = vpop.permute.xlu0 %1332  ;;  %v1331_v44 = vpop.permute.xlu1 %1330 }
 0x1f5   : > { %2056 = vmatmul.mubr.msk.bf16.vlgmr.msra.gmra.mxu1 %vm976_vm3, %v1087_v39  ;;  %v1338_v43 = vsel %vm976_vm3, %v1333_v41, 0 }
 0x1f6   : > { %2066 = vmatpush3.bf16.xpose.msra.mxu1 %v1219_v40  ;;  %2067 = vmatprep.mubr.msk.bf16.mxu1 %vm2570_vm0, %v2569_v0 }
 0x1f7   : > { %2077 = vmatprep.subr.bf16.mxu1 %v2569_v0 }
 0x1fd   : > { %2068 = vmatmul.mubr.msk.bf16.vlgmr.msra.gmra.mxu1 %vm976_vm3, %v1212_v42 }
 0x1fe   : > { %2078 = vmatpush3.bf16.xpose.msra.mxu1 %v1338_v43  ;;  %2079 = vmatprep.mubr.msk.bf16.mxu1 %vm2570_vm0, %v2569_v0 }
 0x1ff   : > { %2089 = vmatprep.subr.bf16.mxu1 %v2569_v0 }
 0x205   : > { %2080 = vmatmul.mubr.msk.bf16.vlgmr.msra.gmra.mxu1 %vm976_vm3, %v1331_v44 }
 0x206   : > { %2093 = vmatprep.mubr.msk.bf16.mxu1 %vm2570_vm0, %v2569_v0 }
 0x240   : > { %v1017_v46 = vpop.f32.mrf.mxu1 }
 0x241   : > { %v1018_v47 = vadd.f32 %v1942_v45, %v1017_v46 }
 0x242   : > { %v2045_v48 = vpop.f32.mrf.mxu1 }
 0x243   : > { %v1023_v49 = vsel %vm976_vm3, %v1018_v47, -inf }
 0x244   : > { %1024 = vmax.xlane.f32.xlu0 %v1023_v49  ;;  %v1020_v50 = vpop.f32.mrf.mxu1 }
 0x246   : > { %v2046_v51 = vpop.f32.mrf.mxu1 }
 0x2b5   : > { %v1133_v52 = vpop.f32.mrf.mxu1 }
 0x2b6   : > { %v1134_v53 = vadd.f32 %v1942_v45, %v1133_v52 }
 0x2b7   : > { %v2057_v54 = vpop.f32.mrf.mxu1 }
 0x2b8   : > { %v1139_v55 = vsel %vm976_vm3, %v1134_v53, -inf }
 0x2b9   : > { %1140 = vmax.xlane.f32.xlu1 %v1139_v55  ;;  %v1136_v56 = vpop.f32.mrf.mxu1 }
 0x2bb   : > { %v2058_v57 = vpop.f32.mrf.mxu1 }
 0x2bd   : > { %v1255_v58 = vpop.f32.mrf.mxu1 }
 0x2be   : > { %v1256_v59 = vadd.f32 %v1942_v45, %v1255_v58 }
 0x2bf   : > { %v2069_v60 = vpop.f32.mrf.mxu1 }
 0x2c0   : > { %v1261_v61 = vsel %vm976_vm3, %v1256_v59, -inf }
 0x2c1   : > { %1262 = vmax.xlane.f32.xlu0 %v1261_v61  ;;  %v1258_v62 = vpop.f32.mrf.mxu1  ;;  %v2248_v61 = vld [vmem:[%s3088_s9 + $0x8] sm:$0xff]  }
 0x2c2   : > { %2090 = vmatpush3.bf16.msra.mxu1 %v2248_v61 }
 0x2c3   : > { %v2070_v63 = vpop.f32.mrf.mxu1  ;;  %2091 = vmatprep.subr.bf16.mxu1 %v2569_v0 }
 0x2c4   : > { %v2249_v63 = vld [vmem:[%s3088_s9] sm:$0xff]  }
 0x2c5   : > { %v1374_v1 = vpop.f32.mrf.mxu1 }
 0x2c6   : > { %v1375_v2 = vadd.f32 %v1942_v45, %v1374_v1  ;;  %2092 = vmatpush3.bf16.msra.mxu1 %v2249_v63 }
 0x2c7   : > { %v2081_v3 = vpop.f32.mrf.mxu1  ;;  %2105 = vmatprep.subr.bf16.mxu1 %v2569_v0 }
 0x2c8   : > { %v1380_v4 = vsel %vm976_vm3, %v1375_v2, -inf }
 0x2c9   : > { %1381 = vmax.xlane.f32.xlu0 %v1380_v4  ;;  %v1377_v5 = vpop.f32.mrf.mxu1 }
 0x2cb   : > { %v2082_v7 = vpop.f32.mrf.mxu1 }
 0x2cd   : > { %v1025_v8 = vpop.xlane.xlu0 %1024 }
 0x2ce   : > { %v1026_v9 = vsub.f32 %v1018_v47, %v1025_v8 }
 0x2d0   : > { %v1027_v10 = vmul.f32 1.442695, %v1026_v9 }
 0x2d2   : > { %2256 = vpow2.f32 %v1027_v10 }
 0x2df   : > { %v2257_v11 = vpop.eup %2256 }
 0x2e0   : > { %v1029_v12 = vsel %vm976_vm3, %v2257_v11, 0.0 }
 0x2e1   : > { %1030 = vadd.xlane.f32.xlu1 %v1029_v12 }
 0x2f2   : > { %1154 = vrot.lane.b32.xlu1 %v1947_v13, %s2572_s16  ;;  %s1975_s16 = sshll.u32 %s3167_s18, 6 }
 0x2f3   : > { %s1749_s17 = scalar_lea.hbm %s3171_s23, %s1975_s16 }
 0x342   : > { %v1141_v14 = vpop.xlane.xlu1 %1140 }
 0x343   : > { %v1142_v15 = vsub.f32 %v1134_v53, %v1141_v14 }
 0x345   : > { %v1143_v16 = vmul.f32 1.442695, %v1142_v15  ;;  %v1956_v15 = vld [vmem:[%s3089_s10] ss:$0 sm:$0xff] }
 0x347   : > { %2258 = vpow2.f32 %v1143_v16  ;;  %v897_v16 = vunpack.c.l.bf16 %v2904_v6 }
 0x34a   : > { %v1263_v17 = vpop.xlane.xlu0 %1262 }
 0x34b   : > { %v1264_v18 = vsub.f32 %v1256_v59, %v1263_v17 }
 0x34d   : > { %v1265_v19 = vmul.f32 1.442695, %v1264_v18 }
 0x34f   : > { %2260 = vpow2.f32 %v1265_v19 }
 0x352   : > { %v1382_v20 = vpop.xlane.xlu0 %1381 }
 0x353   : > { %v1383_v21 = vsub.f32 %v1375_v2, %v1382_v20 }
 0x354   : > { %v2259_v22 = vpop.eup %2258 }
 0x355   : > { %v1384_v23 = vmul.f32 1.442695, %v1383_v21  ;;  %v1145_v24 = vsel %vm976_vm3, %v2259_v22, 0.0 }
 0x356   : > { %1146 = vadd.xlane.f32.xlu0 %v1145_v24 }
 0x357   : > { %2262 = vpow2.f32 %v1384_v23 }
 0x35c   : > { %v2261_v25 = vpop.eup %2260 }
 0x35d   : > { %v1267_v26 = vsel %vm976_vm3, %v2261_v25, 0.0 }
 0x35e   : > { %1268 = vadd.xlane.f32.xlu1 %v1267_v26 }
 0x364   : > { %v2263_v27 = vpop.eup %2262 }
 0x365   : > { %v1386_v28 = vsel %vm976_vm3, %v2263_v27, 0.0 }
 0x366   : > { %1387 = vadd.xlane.f32.xlu0 %v1386_v28 }
 0x36a   : > { %v1031_v29 = vpop.xlane.xlu1 %1030 }
 0x36b   : > { %2264 = vrcp.f32 %v1031_v29  ;;  %v2250_v29 = vld [vmem:[#allocation16 + $0x8] sm:$0xff]  }
 0x36e   : > { %v1155_v32 = vpop.permute.xlu1 %1154 }
 0x36f   : > { %1392 = vrot.lane.b32.xlu1 %v1947_v13, %s2573_s15  ;;  %v1160_v34 = vsel %vm1038_vm4, %v1155_v32, 0  ;;  %s754_s15 = scalar_lea.vmem [#allocation17], %s2855_s8 }
 0x378   : > { %v2265_v30 = vpop.eup %2264 }
 0x379   : > { %v1033_v31 = vmul.f32 %v2265_v30, %v2257_v11  ;;  %v2251_v30 = vld [vmem:[#allocation16] sm:$0xff]  }
 0x37b   : > { %v1034_v33 = vpack.c.bf16 %v1033_v31, %v1033_v31 }
 0x37c   : > { %1273 = vrot.lane.b32.xlu0 %v1947_v13, %s2571_s14  ;;  %s3170_s14 = sld [smem:[#allocation43_spill]] }
 0x37d   : > { %2050 = vmatmul.mubr.msk.bf16.vlgmr.msra.gmra.mxu0 %vm976_vm3, %v1034_v33 }
 0x37e   : > { %2060 = vmatpush3.bf16.msra.mxu0 %v1160_v34  ;;  %2061 = vmatprep.mubr.msk.bf16.mxu0 %vm2570_vm0, %v2569_v0  ;;  %v1960_v34 = vld [vmem:[%s3090_s11] ss:$0 sm:$0xff] }
 0x37f   : > { %2071 = vmatprep.subr.bf16.mxu0 %v2569_v0 }
 0x3df   : > { %v1147_v35 = vpop.xlane.xlu0 %1146 }
 0x3e0   : > { %2266 = vrcp.f32 %v1147_v35 }
 0x3e7   : > { %v1269_v36 = vpop.xlane.xlu1 %1268 }
 0x3e8   : > { %2268 = vrcp.f32 %v1269_v36  ;;  %v1961_v36 = vld [vmem:[%s3163_s28] ss:$0 sm:$0xff]  ;;  %s3169_s28 = sld [smem:[#allocation28_spill]] }
 0x3eb   : > { %v1393_v45 = vpop.permute.xlu1 %1392 }
 0x3ec   : > { %v1398_v47 = vsel %vm1038_vm4, %v1393_v45, 0 }
 0x3ed   : > { %v2267_v37 = vpop.eup %2266 }
 0x3ee   : > { %v1149_v38 = vmul.f32 %v2267_v37, %v2259_v22  ;;  %p3172_p12 = scmp.ne.s32.totalorder %s3169_s28, 0 }
 0x3ef   : > { %v1388_v39 = vpop.xlane.xlu0 %1387 }
 0x3f0   : > { %2270 = vrcp.f32 %v1388_v39  ;;  %v1150_v40 = vpack.c.bf16 %v1149_v38, %v1149_v38 }
 0x3f2   : > { %2062 = vmatmul.mubr.msk.bf16.vlgmr.msra.gmra.mxu0 %vm976_vm3, %v1150_v40  ;;  %v2252_v40 = vld [vmem:[%s3164_s12 + $0x18] sm:$0xff]  }
 0x3f3   : > { %v1274_v41 = vpop.permute.xlu0 %1273  ;;  %2073 = vmatprep.mubr.msk.bf16.mxu0 %vm2570_vm0, %v2569_v0 }
 0x3f4   : > { %v1279_v42 = vsel %vm1038_vm4, %v1274_v41, 0  ;;  %v2253_v41 = vld [vmem:[%s3164_s12 + $0x10] sm:$0xff]  }
 0x3f5   : > { %v2269_v43 = vpop.eup %2268  ;;  %2072 = vmatpush3.bf16.msra.mxu0 %v1279_v42  ;;  %v2254_v42 = vld [vmem:[%s3164_s12 + $0x8] sm:$0xff]  }
 0x3f6   : > { %2083 = vmatprep.subr.bf16.mxu0 %v2569_v0  ;;  %v1271_v44 = vmul.f32 %v2269_v43, %v2261_v25  ;;  %v2255_v43 = vld [vmem:[%s3164_s12] sm:$0xff]  }
 0x3f8   : > { %v1272_v46 = vpack.c.bf16 %v1271_v44, %v1271_v44 }
 0x3fa   : > { %2074 = vmatmul.mubr.msk.bf16.vlgmr.msra.gmra.mxu0 %vm976_vm3, %v1272_v46 }
 0x3fb   : > { %2084 = vmatpush3.bf16.msra.mxu0 %v1398_v47  ;;  %2085 = vmatprep.mubr.msk.bf16.mxu0 %vm2570_vm0, %v2569_v0 }
 0x3fc   : > { %2097 = vmatprep.subr.bf16.mxu0 %v2569_v0 }
 0x3fd   : > { %v2271_v48 = vpop.eup %2270 }
 0x3fe   : > { %v1390_v49 = vmul.f32 %v2271_v48, %v2263_v27 }
 0x400   : > { %v1391_v50 = vpack.c.bf16 %v1390_v49, %v1390_v49 }
 0x402   : > { %2086 = vmatmul.mubr.msk.bf16.vlgmr.msra.gmra.mxu0 %vm976_vm3, %v1391_v50 }
 0x403   : > { %2101 = vmatprep.mubr.msk.bf16.mxu0 %vm2570_vm0, %v2569_v0  ;;  %2098 = vmatpush3.bf16.msra.mxu0 %v2250_v29 }
 0x404   : > { %2099 = vmatprep.subr.bf16.mxu0 %v2569_v0 }
 0x407   : > { %2100 = vmatpush3.bf16.msra.mxu0 %v2251_v30 }
 0x43d   : > { %v1076_v51 = vpop.f32.mrf.mxu0 }
 0x43e   : > { %v1082_v52 = vpack.c.bf16 %v1076_v51, %v1076_v51 }
 0x43f   : > { %v2051_v53 = vpop.f32.mrf.mxu0 }
 0x440   : > { %1084 = vst.msk [vmem:[#allocation4] sm:$0xf] %vm1083_vm5, %v1082_v52 }
 0x441   : > { %v1079_v54 = vpop.f32.mrf.mxu0 }
 0x443   : > { %v2052_v55 = vpop.f32.mrf.mxu0 }
 0x444   : > { %v1966_v55 = vld [vmem:[%s3166_s20] ss:$0 sm:$0xff]  ;;  %s2470_s20 = sshll.u32 %s2577_s2, 4  ;;  %s2471_s20 = int_to_ptr.vmem [resolvable:$false] %s2470_s20 }
 0x445   : > { %s2472_s8 = scalar_lea.vmem %s2471_s20, 128 }
 0x4b2   : > { %v1196_v56 = vpop.f32.mrf.mxu0 }
 0x4b3   : > { %v1978_v57 = vpack.c.bf16 %v1196_v56, %v1196_v56 }
 0x4b4   : > { %v2063_v58 = vpop.f32.mrf.mxu0 }
 0x4b5   : > { %1206 = vrot.lane.b32.xlu1 %v1978_v57, %s2574_s4  ;;  %s1751_s4 = sshll.u32 %s754_s15, 4  ;;  %s1752_s4 = int_to_ptr.vmem [resolvable:$true] %s1751_s4 }
 0x4b6   : > { %v1199_v59 = vpop.f32.mrf.mxu0  ;;  %p2473_p2 = scmp.lt.s32.totalorder %s1752_s4, %s2471_s20 }
 0x4b8   : > { %v2064_v60 = vpop.f32.mrf.mxu0 }
 0x4ba   : > { %v1315_v62 = vpop.f32.mrf.mxu0 }
 0x4bb   : > { %v1979_v1 = vpack.c.bf16 %v1315_v62, %v1315_v62 }
 0x4bc   : > { %v2075_v2 = vpop.f32.mrf.mxu0 }
 0x4bd   : > { %1325 = vrot.lane.b32.xlu0 %v1979_v1, %s2575_s3  ;;  %s3165_s3 = sld [smem:[#allocation39_spill]] }
 0x4be   : > { %v1318_v3 = vpop.f32.mrf.mxu0 }
 0x4c0   : > { %v2076_v4 = vpop.f32.mrf.mxu0 }
 0x4c2   : > { %v1434_v5 = vpop.f32.mrf.mxu0 }
 0x4c3   : > { %v1980_v7 = vpack.c.bf16 %v1434_v5, %v1434_v5  ;;  %v1962_v44 = vld [vmem:[%s3165_s3] ss:$0 sm:$0xff]  ;;  %s1737_s3 = scalar_lea.sflag [#allocation7], %s2852_s6 }
 0x4c4   : > { %v2087_v8 = vpop.f32.mrf.mxu0 }
 0x4c5   : > { %1444 = vrot.lane.b32.xlu1 %v1980_v7, %s2576_s27  ;;  %s2466_s27 = scalar_lea.vmem %s1752_s4, 64 }
 0x4c6   : > { %v1437_v9 = vpop.f32.mrf.mxu0  ;;  %p2467_p10 = scmp.ne.s32.totalorder %s1752_s4, %s2466_s27  ;;  %p2474_p3 = scmp.lt.s32.totalorder %s2472_s8, %s2466_s27 }
 0x4c8   : > { %v2088_v10 = vpop.f32.mrf.mxu0  ;;  %p2468_p4 = pnand %p2467_p10, %p3172_p12  ;;  %p2475_p8 = por %p2474_p3, %p2473_p2 }
 0x4c9   : > { %v1972_v10 = vld [vmem:[%s3168_s24] ss:$0 sm:$0xff] }
 0x4ca   : > { %p2469_p13 = pneg %p2468_p4 }
 0x4cc   : > { %p2476_p9 = pnand %p2475_p8, %p2469_p13 }
 0x527   : > { %v1207_v11 = vpop.permute.xlu1 %1206 }
 0x528   : > { %1210 = vst.msk [vmem:[#allocation4] sm:$0xf] %vm1209_vm6, %v1207_v11 }
 0x52f   : > { %v1326_v12 = vpop.permute.xlu0 %1325 }
 0x530   : > { %1329 = vst.msk [vmem:[#allocation4] sm:$0xf] %vm1328_vm7, %v1326_v12  ;;  %v1973_v12 = vld [vmem:[%s3170_s14] ss:$0 sm:$0xff] }
 0x537   : > { %v1445_v13 = vpop.permute.xlu1 %1444 }
 0x538   : > { %1448 = vst.msk [vmem:[#allocation4] sm:$0xf] %vm1447_vm8, %v1445_v13 }
 0x53f   : > { %v1449_v14 = vld [vmem:[#allocation4] sm:$0xf] }
 0x540   : > { %2094 = vmatmul.mubr.msk.bf16.vlgmr.msra.gmra.mxu1 %vm784_vm1, %v1449_v14 }
 0x541   : > { %2113 = vmatprep.mubr.msk.bf16.mxu1 %vm2570_vm0, %v2569_v0  ;;  %2106 = vmatpush3.bf16.msra.mxu1 %v2252_v40 }
 0x542   : > { %2107 = vmatprep.subr.bf16.mxu1 %v2569_v0 }
 0x545   : > { %2108 = vmatpush3.bf16.msra.mxu1 %v2253_v41 }
 0x546   : > { %2109 = vmatprep.subr.bf16.mxu1 %v2569_v0 }
 0x549   : > { %2110 = vmatpush3.bf16.msra.mxu1 %v2254_v42 }
 0x54a   : > { %2111 = vmatprep.subr.bf16.mxu1 %v2569_v0 }
 0x54d   : > { %2112 = vmatpush3.bf16.msra.mxu1 %v2255_v43 }
 0x600   : > { %v1510_v17 = vpop.f32.mrf.mxu1 }
 0x601   : > { %v1511_v18 = vadd.f32 %v1956_v15, %v1510_v17 }
 0x602   : > { %v2095_v19 = vpop.f32.mrf.mxu1 }
 0x603   : > { %v1516_v20 = vadd.f32 %v1511_v18, %v897_v16 }
 0x604   : > { %v1513_v21 = vpop.f32.mrf.mxu1 }
 0x605   : > { %v1519_v22 = vsel %vm784_vm1, %v1516_v20, 0.0 }
 0x606   : > { %1520 = vadd.xlane.f32.xlu0 %v1519_v22  ;;  %v2096_v23 = vpop.f32.mrf.mxu1 }
 0x68f   : > { %v1521_v24 = vpop.xlane.xlu0 %1520 }
 0x690   : > { %v1523_v25 = vmul.f32 0.03125, %v1521_v24 }
 0x692   : > { %v1524_v26 = vsub.f32 %v1516_v20, %v1523_v25 }
 0x694   : > { %v1525_v27 = vmul.f32 %v1524_v26, %v1524_v26 }
 0x696   : > { %v1526_v28 = vsel %vm784_vm1, %v1525_v27, 0.0 }
 0x697   : > { %1527 = vadd.xlane.f32.xlu1 %v1526_v28 }
 0x720   : > { %v1528_v6 = vpop.xlane.xlu1 %1527 }
 0x721   : > { %v1529_v31 = vmul.f32 0.03125, %v1528_v6 }
 0x723   : > { %v1530_v32 = vadd.f32 1e-12, %v1529_v31 }
 0x725   : > { %2272 = vrsqrt.f32 %v1530_v32 }
 0x732   : > { %v2273_v33 = vpop.eup %2272 }
 0x733   : > { %v1532_v35 = vmul.f32 %v2273_v33, %v1524_v26 }
 0x735   : > { %v1539_v37 = vmul.f32 %v1960_v34, %v1532_v35 }
 0x737   : > { %v1546_v38 = vadd.f32 %v1961_v36, %v1539_v37 }
 0x739   : > { %v1547_v39 = vpack.c.bf16 %v1546_v38, %v1546_v38 }
 0x73b   : > { %2102 = vmatmul.mubr.msk.bf16.vlgmr.msra.gmra.mxu0 %vm784_vm1, %v1547_v39 }
 0x7fb   : > { %v1616_v45 = vpop.f32.mrf.mxu0 }
 0x7fc   : > { %v1617_v46 = vadd.f32 %v1962_v44, %v1616_v45 }
 0x7fd   : > { %v2103_v47 = vpop.f32.mrf.mxu0 }
 0x7fe   : > { %v1623_v48 = vmul.f32 0.70710677, %v1617_v46  ;;  %v1622_v52 = vmul.f32 0.5, %v1617_v46 }
 0x7ff   : > { %v1619_v49 = vpop.f32.mrf.mxu0 }
 0x800   : > { %2274 = verf.f32 %v1623_v48 }
 0x801   : > { %v2104_v50 = vpop.f32.mrf.mxu0 }
 0x80d   : > { %v2275_v51 = vpop.eup %2274 }
 0x80e   : > { %v1625_v53 = vadd.f32 1.0, %v2275_v51 }
 0x810   : > { %v1626_v0 = vmul.f32 %v1625_v53, %v1622_v52 }
 0x812   : > { %v1627_v54 = vpack.c.bf16 %v1626_v0, %v1626_v0 }
 0x814   : > { %2114 = vmatmul.mubr.msk.bf16.vlgmr.msra.gmra.mxu1 %vm1659_vm9, %v1627_v54 }
 0x8d4   : > { %v1697_v56 = vpop.f32.mrf.mxu1 }
 0x8d5   : > { %v1698_v57 = vadd.f32 %v1966_v55, %v1697_v56 }
 0x8d6   : > { %v2115_v58 = vpop.f32.mrf.mxu1 }
 0x8d7   : > { %v1703_v59 = vadd.f32 %v1698_v57, %v1546_v38 }
 0x8d8   : > { %v1700_v60 = vpop.f32.mrf.mxu1 }
 0x8d9   : > { %v1706_v61 = vsel %vm784_vm1, %v1703_v59, 0.0 }
 0x8da   : > { %1707 = vadd.xlane.f32.xlu0 %v1706_v61  ;;  %v2116_v62 = vpop.f32.mrf.mxu1 }
 0x963   : > { %v1708_v63 = vpop.xlane.xlu0 %1707 }
 0x964   : > { %v1709_v1 = vmul.f32 0.03125, %v1708_v63 }
 0x966   : > { %v1710_v2 = vsub.f32 %v1703_v59, %v1709_v1 }
 0x968   : > { %v1711_v3 = vmul.f32 %v1710_v2, %v1710_v2 }
 0x96a   : > { %v1712_v4 = vsel %vm784_vm1, %v1711_v3, 0.0 }
 0x96b   : > { %1713 = vadd.xlane.f32.xlu0 %v1712_v4 }
 0x9f4   : > { %v1714_v5 = vpop.xlane.xlu0 %1713 }
 0x9f5   : > { %v1715_v7 = vmul.f32 0.03125, %v1714_v5 }
 0x9f7   : > { %v1716_v8 = vadd.f32 1e-12, %v1715_v7 }
 0x9f9   : > { %2276 = vrsqrt.f32 %v1716_v8 }
 0xa06   : > { %v2277_v9 = vpop.eup %2276 }
 0xa07   : > { %v1718_v11 = vmul.f32 %v2277_v9, %v1710_v2 }
 0xa09   : > { %v1725_v13 = vmul.f32 %v1972_v10, %v1718_v11 }
 0xa0b   : > { %v1732_v14 = vadd.f32 %v1973_v12, %v1725_v13 }
 0xa0d   : > { %v1733_v15 = vpack.c.bf16 %v1732_v14, %v1732_v14 }
 0xa0f   : > { %1735 = vst.msk [vmem:[%s754_s15] sm:$0xf] %vm892_vm2, %v1733_v15 }
 0xa10   : > { %2479 = shalt.err (!%p2476_p9)
}
 0xa11   : > { %s2480_s18 = scalar_lea.hbm %s1749_s17, 64  ;;  %s2484_s22 = scalar_lea.hbm %s3171_s23, 128 }
 0xa12   : > { %p2481_p1 = scmp.ne.s32.totalorder %s1749_s17, %s2480_s18  ;;  %p2485_p0 = scmp.lt.s32.totalorder %s1749_s17, %s3171_s23 }
 0xa13   : > { %p2486_p7 = scmp.lt.s32.totalorder %s2484_s22, %s2480_s18 }
 0xa14   : > { %p2482_p6 = pnand %p2481_p1, %p3172_p12 }
 0xa15   : > { %p2487_p11 = por %p2486_p7, %p2485_p0 }
 0xa16   : > { %p2483_p5 = pneg %p2482_p6 }
 0xa18   : > { %p2488_p10 = pnand %p2487_p11, %p2483_p5 }
 0xa1a   : > { %2491 = shalt.err (!%p2488_p10)
}
 0xa1b   : > { %2139 = dma.vmem_to_hbm [thread:$0]  (%p3172_p12), %s1752_s4, 64, %s1749_s17, %s1737_s3  }
 0xa1c PF: > { %s3173_s25 = sld [smem:[#allocation23_spill]] }
 0xa1d   : > { %s3174_s14 = sld [smem:[#allocation30_spill]] }
 0xa1e   : > { %s3175_s16 = sld [smem:[#allocation26_spill]] }
 0xa22   : > { %s1763_s15 = sand.u32 1, %s3173_s25  }
 0xa23   : > { %p3176_p4 = scmp.ne.s32.totalorder %s3174_s14, 0  ;;  %s1764_s0 = scalar_lea.sflag [#allocation7], %s1763_s15 }
 0xa24   : > { %p3177_p13 = scmp.ge.s32.totalorder %s3175_s16, 2 }
 0xa26   : > { %p2165_p2 = pnand %p3177_p13, %p3176_p4 }
 0xa28   : > { %p2166_p3 = pneg %p2165_p2 }
 0xa2a   : > { %2533 = dma.done.wait (%p2166_p3), %s1764_s0, 64  }
 0xa2b   : > { %2535 = vsyncadd (%p2166_p3), %s1764_s0, 4294967232  ;;  %s40_s22 = sadd.s32 1, %s3175_s16   ;;  %s3178_s21 = sld [smem:[#allocation24_spill]] }
 0xa2c   : > { %p37_p8 = scmp.ge.s32.totalorder %s40_s22, 4   ;;  %s3179_s20 = sld [smem:[#allocation29_spill]] }
 0xa2d   : > { %s3180_s28 = sld [smem:[#allocation27_spill]]  ;;  %s3181_s0 = smov %s2542_s30 }
 0xa2f   :  { %39 = sbr.rel (!%p37_p8) target bundleno = 25 (0x19), region = 185 }
 0xa31   : > { %s3182_s30 = smov %s3178_s21  ;;  %s3183_s21 = smov %s2554_s1 }
 0xa33   : > { %s3184_s1 = smov %s3180_s28 }
 0xa34   :  { %1769 = vsyncpa [#allocation6], 1 }
 0xa35   :  { %1771 = vsyncpa [#allocation6 + $0x1], 1 }
 0xa36   :  { %1772 = vsyncpa [#allocation9], 1 }
 0xa37   :  { %1774 = vsyncpa [#allocation9 + $0x1], 1 }
 0xa38   :  { %1775 = vsyncpa [#allocation12], 1 }
 0xa39   :  { %1776 = vsyncpa [#allocation15], 1 }
 0xa3a   :  { %1777 = vsyncpa [#allocation7], 1 }
 0xa3b   :  { %1779 = vsyncpa [#allocation7 + $0x1], 1 }

</bundles_post_ra>
